<compile_context>
chip_gen: v7x
topology: tpu7x:2x2x1
jax: 0.10.0
libtpu: 0.0.40
codegen_flags: <defaults>
</compile_context>

<pallas_src>
import functools
import math

import jax
import jax.numpy as jnp
from jax import lax
from jax.experimental import pallas as pl
from jax.experimental.pallas import tpu as pltpu


# ----------------------------------------------------------------------------
# Tiling helpers
# ----------------------------------------------------------------------------
M_PREF, N_PREF, K_PREF = 512, 256, 2048        # MXU matmul tile preferences
TR_PREF, TC_PREF = 1024, 512                   # elementwise (rows, channels) tile prefs
_VMEM_LIMIT = 48 * 1024 * 1024                 # fits v5e/v6e (128 MiB) and v7x (64 MiB)


def _cp(sem):
    return pltpu.CompilerParams(dimension_semantics=sem,
                                vmem_limit_bytes=_VMEM_LIMIT)


def _ceil(a, m):
    return -(-a // m) * m


def _tile_and_pad(dim, align, pref):
    """(tile, padded_dim).  If dim <= pref: one full-dim block (exempt from the (8,128)
    alignment rule) -> no pad, no tail slice.  Otherwise prefer an aligned divisor."""
    if dim <= pref:
        return dim, dim
    dp = _ceil(dim, align)
    for t in range(pref, align - 1, -align):
        if dp % t == 0:
            return t, dp
    return pref, _ceil(dp, pref)


# ----------------------------------------------------------------------------
# Matmul kernel (bf16 MXU, f32 accumulate, fused bias/ReLU + BN-stats epilogue)
# ----------------------------------------------------------------------------
def _matmul_kernel(*refs, has_bias, relu, want_stats):
    a_ref, b_ref = refs[0], refs[1]
    i = 2
    if has_bias:
        s_ref = refs[i]; i += 1
    o_ref = refs[i]; i += 1
    if want_stats:
        sum_ref, ssq_ref = refs[i], refs[i + 1]; i += 2
    acc_ref = refs[i]

    k = pl.program_id(2)

    @pl.when(k == 0)
    def _():
        acc_ref[...] = jnp.zeros_like(acc_ref)

    acc_ref[...] += jnp.dot(a_ref[...], b_ref[...],
                            preferred_element_type=jnp.float32)

    @pl.when(k == pl.num_programs(2) - 1)
    def _():
        y = acc_ref[...]
        if has_bias:
            y = y + s_ref[...]
        if relu:
            y = jnp.maximum(y, 0.0)
        o_ref[...] = y.astype(o_ref.dtype)
        if want_stats:
            sum_ref[...] = jnp.sum(y, axis=0, keepdims=True)
            ssq_ref[...] = jnp.sum(y * y, axis=0, keepdims=True)


@functools.partial(jax.jit, static_argnames=("relu", "want_stats", "out_dtype"))
def matmul_pallas(a, b, bias=None, relu=False, want_stats=False,
                  out_dtype=jnp.bfloat16):
    """C = relu?(A @ B + bias); optional per-column (sum, sum-sq) of C as extra outputs."""
    M, K = a.shape
    _, N = b.shape
    TM, Mp = _tile_and_pad(M, 8, M_PREF)
    TN, Np = _tile_and_pad(N, 128, N_PREF)
    TK, Kp = _tile_and_pad(K, 128, K_PREF)

    # v7x: make sure at least one *parallel* axis has >= 2 steps when possible.
    if Mp // TM == 1 and Np // TN == 1:
        if TN % 256 == 0:
            TN //= 2
        elif TM % 16 == 0:
            TM //= 2
    nm, nn, nk = Mp // TM, Np // TN, Kp // TK

    a = a.astype(jnp.bfloat16)
    b = b.astype(jnp.bfloat16)
    if Mp != M or Kp != K:            # does not trigger for any shape in this model
        a = jnp.pad(a, ((0, Mp - M), (0, Kp - K)))
    if Kp != K or Np != N:
        b = jnp.pad(b, ((0, Kp - K), (0, Np - N)))

    has_bias = bias is not None
    in_specs = [pl.BlockSpec((TM, TK), lambda i, j, k: (i, k)),
                pl.BlockSpec((TK, TN), lambda i, j, k: (k, j))]
    args = [a, b]
    if has_bias:
        s = bias.astype(jnp.float32).reshape(1, N)
        if Np != N:
            s = jnp.pad(s, ((0, 0), (0, Np - N)))
        in_specs.append(pl.BlockSpec((1, TN), lambda i, j, k: (0, j)))
        args.append(s)

    out_shapes = [jax.ShapeDtypeStruct((Mp, Np), out_dtype)]
    out_specs = [pl.BlockSpec((TM, TN), lambda i, j, k: (i, j))]
    if want_stats:
        out_shapes += [jax.ShapeDtypeStruct((nm, 1, Np), jnp.float32)] * 2
        out_specs += [pl.BlockSpec((None, 1, TN), lambda i, j, k: (i, 0, j))] * 2

    outs = pl.pallas_call(
        functools.partial(_matmul_kernel, has_bias=has_bias, relu=relu,
                          want_stats=want_stats),
        out_shape=tuple(out_shapes),
        grid_spec=pltpu.PrefetchScalarGridSpec(
            num_scalar_prefetch=0,
            grid=(nm, nn, nk),
            in_specs=in_specs,
            out_specs=tuple(out_specs),
            scratch_shapes=[pltpu.VMEM((TM, TN), jnp.float32)]),
        compiler_params=_cp(("parallel", "parallel", "arbitrary")),
    )(*args)

    y = outs[0]
    if Mp != M or Np != N:
        y = y[:M, :N]
    if want_stats:
        s_c = jnp.sum(outs[1], axis=0)[0, :N]
        ss_c = jnp.sum(outs[2], axis=0)[0, :N]
        return y, s_c, ss_c
    return y


# ----------------------------------------------------------------------------
# Tap-accumulating stride-1 conv kernel (no im2col materialization in HBM)
# ----------------------------------------------------------------------------
def _conv_tap_kernel(*refs, kh, kw, has_bias, relu, want_stats):
    x_ref, w_ref = refs[0], refs[1]
    i = 2
    if has_bias:
        b_ref = refs[i]; i += 1
    o_ref = refs[i]; i += 1
    if want_stats:
        sum_ref, ssq_ref = refs[i], refs[i + 1]

    HO, WO, TCO = o_ref.shape
    CIN = x_ref.shape[-1]

    acc = jnp.zeros((HO * WO, TCO), jnp.float32)
    for dh in range(kh):
        for dw in range(kw):
            xs = x_ref[dh:dh + HO, dw:dw + WO, :]
            xs2 = xs.reshape(HO * WO, CIN)
            wk = w_ref[dh, dw]                          # (CIN, TCO)
            if CIN == 1:                                 # degenerate K: VPU broadcast-mul
                acc = acc + xs2.astype(jnp.float32) * wk.astype(jnp.float32)
            else:
                acc = acc + jnp.dot(xs2, wk, preferred_element_type=jnp.float32)

    y = acc
    if has_bias:
        y = y + b_ref[...]
    if relu:
        y = jnp.maximum(y, 0.0)
    o_ref[...] = y.reshape(HO, WO, TCO).astype(o_ref.dtype)
    if want_stats:
        sum_ref[...] = jnp.sum(y, axis=0, keepdims=True)
        ssq_ref[...] = jnp.sum(y * y, axis=0, keepdims=True)


@functools.partial(jax.jit, static_argnames=("pad", "relu", "want_stats"))
def conv_tap_pallas(x, w, bias=None, pad=0, relu=False, want_stats=False):
    """Stride-1 NHWC conv: one input DMA per (image, cout tile), kh*kw tap accumulate."""
    N, H, W, CIN = x.shape
    kh, kw, _, COUT = w.shape
    HO = H + 2 * pad - kh + 1
    WO = W + 2 * pad - kw + 1
    if pad:
        x = jnp.pad(x, ((0, 0), (pad, pad), (pad, pad), (0, 0)))
    HP, WP = H + 2 * pad, W + 2 * pad

    TCO, COUTP = _tile_and_pad(COUT, 128, N_PREF)
    assert COUTP == COUT          # all couts here are <= 256 or multiples of 128
    nco = COUT // TCO

    has_bias = bias is not None
    in_specs = [pl.BlockSpec((None, HP, WP, CIN), lambda n, j: (n, 0, 0, 0)),
                pl.BlockSpec((kh, kw, CIN, TCO), lambda n, j: (0, 0, 0, j))]
    args = [x, w]
    if has_bias:
        in_specs.append(pl.BlockSpec((1, TCO), lambda n, j: (0, j)))
        args.append(bias.astype(jnp.float32).reshape(1, COUT))

    out_shapes = [jax.ShapeDtypeStruct((N, HO, WO, COUT), jnp.bfloat16)]
    out_specs = [pl.BlockSpec((None, HO, WO, TCO), lambda n, j: (n, 0, 0, j))]
    if want_stats:
        out_shapes += [jax.ShapeDtypeStruct((N, 1, COUT), jnp.float32)] * 2
        out_specs += [pl.BlockSpec((None, 1, TCO), lambda n, j: (n, 0, j))] * 2

    outs = pl.pallas_call(
        functools.partial(_conv_tap_kernel, kh=kh, kw=kw, has_bias=has_bias,
                          relu=relu, want_stats=want_stats),
        out_shape=tuple(out_shapes),
        grid_spec=pltpu.PrefetchScalarGridSpec(
            num_scalar_prefetch=0,
            grid=(N, nco),
            in_specs=in_specs,
            out_specs=tuple(out_specs)),
        compiler_params=_cp(("parallel", "parallel")),
    )(*args)

    y = outs[0]
    if want_stats:
        s = jnp.sum(outs[1], axis=0)[0]
        ss = jnp.sum(outs[2], axis=0)[0]
        return y, s, ss
    return y


# ----------------------------------------------------------------------------
# Fused BatchNorm-apply (+residual)(+ReLU) elementwise kernels (bf16 in/out)
# ----------------------------------------------------------------------------
def _affine_kernel(x_ref, s_ref, b_ref, o_ref, *, relu):
    y = x_ref[...].astype(jnp.float32) * s_ref[...] + b_ref[...]
    if relu:
        y = jnp.maximum(y, 0.0)
    o_ref[...] = y.astype(o_ref.dtype)


def _affine_res_kernel(x_ref, s_ref, b_ref, r_ref, o_ref, *, relu):
    y = (x_ref[...].astype(jnp.float32) * s_ref[...] + b_ref[...]
         + r_ref[...].astype(jnp.float32))
    if relu:
        y = jnp.maximum(y, 0.0)
    o_ref[...] = y.astype(o_ref.dtype)


def _elementwise_tiles(R, C):
    pref_r = min(16384, max(TR_PREF, (1 << 21) // max(2 * C, 1)))   # ~2 MB bf16 blocks
    TRr, Rp = _tile_and_pad(R, 8, pref_r)
    TCc, Cp = _tile_and_pad(C, 128, TC_PREF)
    if Rp == TRr and Cp == TCc and TRr % 16 == 0 and TRr >= 1024:
        TRr //= 2                                       # >= 2 parallel steps for v7x
    return TRr, Rp, TCc, Cp


@functools.partial(jax.jit, static_argnames=("relu",))
def affine_pallas(x, scale, bias, relu):
    R, C = x.shape
    TRr, Rp, TCc, Cp = _elementwise_tiles(R, C)
    if Rp != R or Cp != C:
        x = jnp.pad(x, ((0, Rp - R), (0, Cp - C)))
    s = scale.astype(jnp.float32).reshape(1, C)
    b = bias.astype(jnp.float32).reshape(1, C)
    if Cp != C:
        s = jnp.pad(s, ((0, 0), (0, Cp - C)))
        b = jnp.pad(b, ((0, 0), (0, Cp - C)))
    out = pl.pallas_call(
        functools.partial(_affine_kernel, relu=relu),
        out_shape=jax.ShapeDtypeStruct((Rp, Cp), jnp.bfloat16),
        grid=(Rp // TRr, Cp // TCc),
        in_specs=[pl.BlockSpec((TRr, TCc), lambda i, j: (i, j)),
                  pl.BlockSpec((1, TCc), lambda i, j: (0, j)),
                  pl.BlockSpec((1, TCc), lambda i, j: (0, j))],
        out_specs=pl.BlockSpec((TRr, TCc), lambda i, j: (i, j)),
        compiler_params=_cp(("parallel", "parallel")),
    )(x, s, b)
    if Rp != R or Cp != C:
        out = out[:R, :C]
    return out


@functools.partial(jax.jit, static_argnames=("relu",))
def affine_res_pallas(x, scale, bias, res, relu):
    R, C = x.shape
    TRr, Rp, TCc, Cp = _elementwise_tiles(R, C)
    if Rp != R or Cp != C:
        x = jnp.pad(x, ((0, Rp - R), (0, Cp - C)))
        res = jnp.pad(res, ((0, Rp - R), (0, Cp - C)))
    s = scale.astype(jnp.float32).reshape(1, C)
    b = bias.astype(jnp.float32).reshape(1, C)
    if Cp != C:
        s = jnp.pad(s, ((0, 0), (0, Cp - C)))
        b = jnp.pad(b, ((0, 0), (0, Cp - C)))
    out = pl.pallas_call(
        functools.partial(_affine_res_kernel, relu=relu),
        out_shape=jax.ShapeDtypeStruct((Rp, Cp), jnp.bfloat16),
        grid=(Rp // TRr, Cp // TCc),
        in_specs=[pl.BlockSpec((TRr, TCc), lambda i, j: (i, j)),
                  pl.BlockSpec((1, TCc), lambda i, j: (0, j)),
                  pl.BlockSpec((1, TCc), lambda i, j: (0, j)),
                  pl.BlockSpec((TRr, TCc), lambda i, j: (i, j))],
        out_specs=pl.BlockSpec((TRr, TCc), lambda i, j: (i, j)),
        compiler_params=_cp(("parallel", "parallel")),
    )(x, s, b, res)
    if Rp != R or Cp != C:
        out = out[:R, :C]
    return out


# ----------------------------------------------------------------------------
# Small elementwise kernels: softmax, ConvLSTM cell, diffusion q_sample
# ----------------------------------------------------------------------------
def _softmax_kernel(x_ref, o_ref):
    x = x_ref[...]
    m = jnp.max(x, axis=-1, keepdims=True)
    e = jnp.exp(x - m)
    o_ref[...] = e / jnp.sum(e, axis=-1, keepdims=True)


@jax.jit
def softmax_pallas(x):
    N, C = x.shape
    Np, Cp = _ceil(N, 8), _ceil(C, 128)
    xp = jnp.pad(x, ((0, Np - N), (0, Cp - C)), constant_values=-1e30)
    out = pl.pallas_call(
        _softmax_kernel,
        out_shape=jax.ShapeDtypeStruct((Np, Cp), jnp.float32),
    )(xp)
    return out[:N, :C]


def _lstm_cell_kernel(g_ref, c_ref, h_out_ref, c_out_ref):
    C = c_ref.shape[1]
    g = g_ref[...].astype(jnp.float32)
    i = jax.nn.sigmoid(g[:, 0 * C:1 * C])
    f = jax.nn.sigmoid(g[:, 1 * C:2 * C])
    cc = jnp.tanh(g[:, 2 * C:3 * C])
    o = jax.nn.sigmoid(g[:, 3 * C:4 * C])
    c_new = f * c_ref[...] + i * cc
    h_out_ref[...] = (o * jnp.tanh(c_new)).astype(h_out_ref.dtype)
    c_out_ref[...] = c_new


@jax.jit
def lstm_cell_pallas(gates, c_prev):
    """ConvLSTM cell gates. gates: (R, 4C) bf16, c_prev: (R, C) f32."""
    R, C4 = gates.shape
    C = C4 // 4
    Rp = _ceil(R, 8)
    gp = jnp.pad(gates, ((0, Rp - R), (0, 0)))
    cp = jnp.pad(c_prev, ((0, Rp - R), (0, 0)))
    h, c = pl.pallas_call(
        _lstm_cell_kernel,
        out_shape=(jax.ShapeDtypeStruct((Rp, C), jnp.bfloat16),
                   jax.ShapeDtypeStruct((Rp, C), jnp.float32)),
    )(gp, cp)
    return h[:R], c[:R]


def _qsample_kernel(x0_ref, eps_ref, a_ref, b_ref, o_ref):
    o_ref[...] = a_ref[...] * x0_ref[...] + b_ref[...] * eps_ref[...]


@jax.jit
def qsample_pallas(x0, eps, a, b):
    R, D = x0.shape
    Rp = _ceil(R, 8)
    pad = ((0, Rp - R), (0, 0))
    out = pl.pallas_call(
        _qsample_kernel,
        out_shape=jax.ShapeDtypeStruct((Rp, D), jnp.float32),
    )(jnp.pad(x0, pad), jnp.pad(eps, pad),
      jnp.pad(a.reshape(-1, 1), pad), jnp.pad(b.reshape(-1, 1), pad))
    return out[:R]


# ----------------------------------------------------------------------------
# Conv / BN building blocks (glue in plain JAX)
# ----------------------------------------------------------------------------
def im2col(x, kh, kw, stride, pad):
    # TODO(synk): only used for stride>1 convs (7x7 stems, 3x3 downsamples); patches are
    # materialized there; a strided tap-conv grid would remove this too.
    N, H, W, C = x.shape
    if pad > 0:
        x = jnp.pad(x, ((0, 0), (pad, pad), (pad, pad), (0, 0)))
    Ho = (H + 2 * pad - kh) // stride + 1
    Wo = (W + 2 * pad - kw) // stride + 1
    cols = []
    for dh in range(kh):
        for dw in range(kw):
            cols.append(x[:, dh:dh + (Ho - 1) * stride + 1:stride,
                          dw:dw + (Wo - 1) * stride + 1:stride, :])
    return jnp.concatenate(cols, axis=-1), Ho, Wo


def conv2d(x, w, stride=1, pad=0, bias=None, relu=False, want_stats=False):
    """x: (N,H,W,Cin) NHWC, w: (kh,kw,Cin,Cout) bf16. Returns bf16 NHWC (+stats)."""
    kh, kw, cin, cout = w.shape
    N = x.shape[0]
    if x.dtype != jnp.bfloat16:
        x = x.astype(jnp.bfloat16)
    if stride == 1 and (kh > 1 or kw > 1 or pad > 0):
        return conv_tap_pallas(x, w, bias=bias, pad=pad, relu=relu,
                               want_stats=want_stats)
    if kh == 1 and kw == 1:
        xs = x[:, ::stride, ::stride, :] if stride > 1 else x
        Ho, Wo = xs.shape[1], xs.shape[2]
        cols, kdim = xs.reshape(-1, cin), cin
    else:
        cols, Ho, Wo = im2col(x, kh, kw, stride, pad)
        cols, kdim = cols.reshape(-1, kh * kw * cin), kh * kw * cin
    res = matmul_pallas(cols, w.reshape(kdim, cout), bias=bias, relu=relu,
                        want_stats=want_stats)
    if want_stats:
        y, s, ss = res
        return y.reshape(N, Ho, Wo, cout), s, ss
    return res.reshape(N, Ho, Wo, cout)


def conv_transpose2x2(x, w, want_stats=False):
    """PyTorch ConvTranspose2d(kernel=2, stride=2).  w: (Cin, 2, 2, Cout) bf16.
    Bias dropped on purpose: exactly cancelled by the following training-mode BN."""
    N, H, W, Cin = x.shape
    cout = w.shape[-1]
    res = matmul_pallas(x.astype(jnp.bfloat16).reshape(-1, Cin),
                        w.reshape(Cin, 4 * cout), want_stats=want_stats)
    y = res[0] if want_stats else res
    y = y.reshape(N, H, W, 2, 2, cout)
    y = jnp.transpose(y, (0, 1, 3, 2, 4, 5)).reshape(N, 2 * H, 2 * W, cout)
    if want_stats:
        s = res[1].reshape(4, cout).sum(axis=0)
        ss = res[2].reshape(4, cout).sum(axis=0)
        return y, s, ss
    return y


def batchnorm_apply(y, s, ss, gamma, beta, relu=False, residual=None, eps=1e-5):
    """Training-mode BatchNorm2d from precomputed per-channel (sum, sum-sq) stats,
    fused with optional residual add and ReLU.  Stats come from the conv epilogue
    (pre-ReLU, roughly zero-mean), which limits E[x^2]-E[x]^2 cancellation."""
    N, H, W, C = y.shape
    R = N * H * W
    mean = s / R
    var = jnp.maximum(ss / R - mean * mean, 0.0)       # biased variance (BN training)
    scale = gamma * lax.rsqrt(var + eps)
    bias = beta - mean * scale
    y2 = y.reshape(R, C)
    if residual is None:
        out = affine_pallas(y2, scale, bias, relu)
    else:
        out = affine_res_pallas(y2, scale, bias, residual.reshape(R, C), relu)
    return out.reshape(N, H, W, C)


def maxpool3x3s2(x):
    # TODO(synk): pooling via lax.reduce_window (XLA), not a dedicated Pallas kernel.
    return lax.reduce_window(x, jnp.asarray(-jnp.inf, x.dtype), lax.max,
                             (1, 3, 3, 1), (1, 2, 2, 1),
                             ((0, 0), (1, 1), (1, 1), (0, 0)))


def avgpool(x, k, stride):
    s = lax.reduce_window(x, jnp.asarray(0.0, x.dtype), lax.add,
                          (1, k, k, 1), (1, stride, stride, 1), "VALID")
    return s / float(k * k)


# ----------------------------------------------------------------------------
# Deterministic parameter initialization (weights pre-cast to bf16 for the MXU)
# ----------------------------------------------------------------------------
MODEL_CHANNELS = 64
CHANNEL_MULT = (1, 1, 2, 4)
NUM_DIFF_STEPS = 100


class _RNG:
    def __init__(self, seed):
        self._key = jax.random.PRNGKey(seed)

    def next(self):
        self._key, sub = jax.random.split(self._key)
        return sub


def _conv_w(rng, kh, kw, cin, cout):
    w = (jax.random.normal(rng.next(), (kh, kw, cin, cout), jnp.float32)
         / math.sqrt(kh * kw * cin))
    return w.astype(jnp.bfloat16)


def _dense_w(rng, cin, cout):
    w = jax.random.normal(rng.next(), (cin, cout), jnp.float32) / math.sqrt(cin)
    return w.astype(jnp.bfloat16)


def _bn(c):
    return (jnp.ones((c,), jnp.float32), jnp.zeros((c,), jnp.float32))


def init_bottleneck(rng, inplanes, planes, stride, downsample):
    p = {"stride": stride,
         "w1": _conv_w(rng, 1, 1, inplanes, planes), "bn1": _bn(planes),
         "w2": _conv_w(rng, 3, 3, planes, planes), "bn2": _bn(planes),
         "w3": _conv_w(rng, 1, 1, planes, planes * 4), "bn3": _bn(planes * 4)}
    if downsample:
        p["wd"] = _conv_w(rng, 1, 1, inplanes, planes * 4)
        p["bnd"] = _bn(planes * 4)
    return p


def init_layer(rng, inplanes, planes, blocks, stride):
    ds = stride != 1 or inplanes != planes * 4
    layer = [init_bottleneck(rng, inplanes, planes, stride, ds)]
    inplanes = planes * 4
    for _ in range(1, blocks):
        layer.append(init_bottleneck(rng, inplanes, planes, 1, False))
    return layer, inplanes


def init_encoder(rng):
    p = {"conv1_scene": _conv_w(rng, 7, 7, 4, 64), "bn1_scene": _bn(64),
         "conv1_face": _conv_w(rng, 7, 7, 3, 64), "bn1_face": _bn(64)}
    cfg = [(64, 3, 1), (128, 4, 2), (256, 6, 2), (512, 3, 2), (256, 2, 1)]
    for branch in ("scene", "face"):
        inplanes = 64
        layers = []
        for planes, blocks, stride in cfg:
            layer, inplanes = init_layer(rng, inplanes, planes, blocks, stride)
            layers.append(layer)
        p[branch + "_layers"] = layers
    p["attn_w"] = _dense_w(rng, 1808, 49)
    p["attn_b"] = jnp.zeros((49,), jnp.float32)
    return p


def init_unet(rng, mc, mults, in_ch, out_ch):
    # TODO(synk): exact UNetModel definition is not provided with the module; this is a
    # lightweight context-conditioned UNet stand-in with matching context shapes.
    chans = [mc * m for m in mults]
    p = {"mc": mc, "chans": chans}
    p["tw1"], p["tb1"] = _dense_w(rng, mc, 4 * mc), jnp.zeros((4 * mc,), jnp.float32)
    p["tw2"], p["tb2"] = _dense_w(rng, 4 * mc, 4 * mc), jnp.zeros((4 * mc,), jnp.float32)
    p["in_w"] = _conv_w(rng, 3, 3, in_ch, chans[0])
    p["down_w"] = [_conv_w(rng, 3, 3, chans[max(l - 1, 0)], chans[l]) for l in range(4)]
    p["tproj_w"] = [_dense_w(rng, 4 * mc, chans[l]) for l in range(4)]
    p["tproj_b"] = [jnp.zeros((chans[l],), jnp.float32) for l in range(4)]
    p["up_w"] = {l: _conv_w(rng, 3, 3, chans[l + 1], chans[l]) for l in (2, 1, 0)}
    p["out_w"] = _conv_w(rng, 3, 3, chans[0], out_ch)
    return p


def init_params(seed=0):
    rng = _RNG(seed)
    p = {"enc": init_encoder(rng)}
    out_ch = MODEL_CHANNELS * CHANNEL_MULT[3]   # 256
    up2 = MODEL_CHANNELS * CHANNEL_MULT[2]      # 128
    up1 = MODEL_CHANNELS * CHANNEL_MULT[1]      # 64
    up0 = MODEL_CHANNELS * CHANNEL_MULT[0]      # 64
    p["compress_w"] = _conv_w(rng, 1, 1, 2048, out_ch)
    p["compress_bn"] = _bn(out_ch)

    hidden = 256
    p["lstm"] = {"hidden": hidden,
                 "layers": [{"w": _conv_w(rng, 3, 3,
                                          (256 if l == 0 else hidden) + hidden,
                                          4 * hidden),
                             "b": jnp.zeros((4 * hidden,), jnp.float32)}
                            for l in range(2)]}

    def _convT_w(cin, cout):
        w = (jax.random.normal(rng.next(), (cin, 2, 2, cout), jnp.float32)
             / math.sqrt(cin * 4))
        return w.astype(jnp.bfloat16)

    p["up2_w"], p["up2_bn"] = _convT_w(256, up2), _bn(up2)
    p["up1_w"], p["up1_bn"] = _convT_w(up2, up1), _bn(up1)
    p["up0_w"], p["up0_bn"] = _convT_w(up1, up0), _bn(up0)

    # TODO(synk): exact GaussianDiffusion implementation not provided; linear schedule.
    betas = jnp.linspace(1e-4, 0.02, NUM_DIFF_STEPS, dtype=jnp.float32)
    p["alphas_cumprod"] = jnp.cumprod(1.0 - betas)

    p["unet"] = init_unet(rng, MODEL_CHANNELS, CHANNEL_MULT, 1, 1)
    return p


# ----------------------------------------------------------------------------
# Model forward (forward_train path)
# ----------------------------------------------------------------------------
def bottleneck_forward(x, p):
    out, s, ss = conv2d(x, p["w1"], want_stats=True)
    out = batchnorm_apply(out, s, ss, *p["bn1"], relu=True)
    out, s, ss = conv2d(out, p["w2"], stride=p["stride"], pad=1, want_stats=True)
    out = batchnorm_apply(out, s, ss, *p["bn2"], relu=True)
    out, s, ss = conv2d(out, p["w3"], want_stats=True)
    if "wd" in p:
        idt, sd, ssd = conv2d(x, p["wd"], stride=p["stride"], want_stats=True)
        idt = batchnorm_apply(idt, sd, ssd, *p["bnd"], relu=False)
    else:
        idt = x
    return batchnorm_apply(out, s, ss, *p["bn3"], relu=True, residual=idt)


def _backbone(x, conv1_w, bn1, layers_list):
    h, s, ss = conv2d(x, conv1_w, stride=2, pad=3, want_stats=True)
    h = batchnorm_apply(h, s, ss, bn1[0], bn1[1], relu=True)
    h = maxpool3x3s2(h)
    for layer in layers_list:
        for blk in layer:
            h = bottleneck_forward(h, blk)
    return h


def encoder_forward(p, images, head, face):
    face_feat = _backbone(face, p["conv1_face"], p["bn1_face"], p["face_layers"])  # (N,7,7,1024)
    head_red = maxpool3x3s2(maxpool3x3s2(maxpool3x3s2(head)))
    head_red = head_red.reshape(head.shape[0], -1)                                 # (N,784)
    face_red = avgpool(face_feat, 7, 1).reshape(face.shape[0], -1)                 # (N,1024)
    attn_in = jnp.concatenate([head_red, face_red.astype(jnp.float32)], axis=1)    # (N,1808)
    attn_w = matmul_pallas(attn_in, p["attn_w"], bias=p["attn_b"],
                           out_dtype=jnp.float32)
    attn_w = softmax_pallas(attn_w).astype(jnp.bfloat16).reshape(-1, 7, 7, 1)
    im = jnp.concatenate([images, head], axis=-1)                                  # (N,224,224,4)
    scene_feat = _backbone(im, p["conv1_scene"], p["bn1_scene"], p["scene_layers"])
    return jnp.concatenate([attn_w * scene_feat, face_feat], axis=-1)              # (N,7,7,2048)


def convlstm_forward(x, batch_sizes, lp):
    # TODO(synk): assumes a uniform PackedSequence (constant batch size per step); the
    # convolutional_rnn inter-layer dropout (training) is omitted.
    T = len(batch_sizes)
    B = batch_sizes[0]
    _, H, W, C = x.shape
    hidden = lp["hidden"]
    seq = x.reshape(T, B, H, W, C)
    h_n, c_n = [], []
    for layer in lp["layers"]:
        h = jnp.zeros((B, H, W, hidden), jnp.bfloat16)
        c = jnp.zeros((B * H * W, hidden), jnp.float32)
        outs = []
        for ts in range(T):
            xh = jnp.concatenate([seq[ts].astype(jnp.bfloat16), h], axis=-1)
            gates = conv2d(xh, layer["w"], stride=1, pad=1, bias=layer["b"])
            h_flat, c = lstm_cell_pallas(gates.reshape(B * H * W, 4 * hidden), c)
            h = h_flat.reshape(B, H, W, hidden)
            outs.append(h)
        seq = jnp.stack(outs, axis=0)
        h_n.append(h)
        c_n.append(c.reshape(B, H, W, hidden))
    y = seq.reshape(T * B, H, W, hidden)
    return y, (jnp.stack(h_n), jnp.stack(c_n))


def timestep_embedding(t, dim):
    half = dim // 2
    freqs = jnp.exp(-math.log(10000.0) * jnp.arange(half, dtype=jnp.float32) / half)
    args = t[:, None] * freqs[None, :]
    return jnp.concatenate([jnp.cos(args), jnp.sin(args)], axis=-1)


def unet_forward(p, x, t, context):
    mc = p["mc"]
    temb = timestep_embedding(t, mc)
    temb = matmul_pallas(temb, p["tw1"], bias=p["tb1"], relu=True,
                         out_dtype=jnp.float32)
    temb = matmul_pallas(temb, p["tw2"], bias=p["tb2"], out_dtype=jnp.float32)
    h = conv2d(x, p["in_w"], pad=1)
    skips = []
    for l in range(4):
        if l > 0:
            h = avgpool(h, 2, 2)
        g = conv2d(h, p["down_w"][l], pad=1)
        tp = matmul_pallas(temb, p["tproj_w"][l], bias=p["tproj_b"][l],
                           out_dtype=jnp.float32)
        h = jnp.maximum(g + tp[:, None, None, :].astype(jnp.bfloat16) + context[l], 0.0)
        skips.append(h)
    for l in (2, 1, 0):
        h = jnp.repeat(jnp.repeat(h, 2, axis=1), 2, axis=2)
        h = jnp.maximum(conv2d(h, p["up_w"][l], pad=1) + skips[l], 0.0)
    return conv2d(h, p["out_w"], pad=1)


def gf_diffusion_forward_train(params, images, head, face, gt_hm, batch_sizes, key):
    """forward_train of GF_Diffusion_Model_temporal. Inputs NCHW, outputs NCHW."""
    to_nhwc = lambda a: jnp.transpose(a, (0, 2, 3, 1)).astype(jnp.float32)
    images, head, face, gt_hm = map(to_nhwc, (images, head, face, gt_hm))

    feature = encoder_forward(params["enc"], images, head, face)        # (N,7,7,2048)
    feature, s, ss = conv2d(feature, params["compress_w"], want_stats=True)
    feature = batchnorm_apply(feature, s, ss, *params["compress_bn"], relu=True)

    y, hx = convlstm_forward(feature, batch_sizes, params["lstm"])      # (N,7,7,256)

    idx = (jnp.arange(8) * 7) // 8                                      # nn.Upsample((8,8)) nearest
    c3 = y[:, idx][:, :, idx]                                           # (N,8,8,256)
    c2, s, ss = conv_transpose2x2(c3, params["up2_w"], want_stats=True)
    c2 = batchnorm_apply(c2, s, ss, *params["up2_bn"], relu=True)       # (N,16,16,128)
    c1, s, ss = conv_transpose2x2(c2, params["up1_w"], want_stats=True)
    c1 = batchnorm_apply(c1, s, ss, *params["up1_bn"], relu=True)       # (N,32,32,64)
    c0, s, ss = conv_transpose2x2(c1, params["up0_w"], want_stats=True)
    c0 = batchnorm_apply(c0, s, ss, *params["up0_bn"], relu=True)       # (N,64,64,64)

    N = images.shape[0]
    kt, ke = jax.random.split(key)
    t = jax.random.randint(kt, (N,), 1, NUM_DIFF_STEPS + 1)
    eps = jax.random.normal(ke, gt_hm.shape, dtype=jnp.float32)
    ac = params["alphas_cumprod"][t - 1]
    hm_t = qsample_pallas(gt_hm.reshape(N, -1), eps.reshape(N, -1),
                          jnp.sqrt(ac), jnp.sqrt(1.0 - ac)).reshape(gt_hm.shape)

    eps_est = unet_forward(params["unet"], hm_t, t.astype(jnp.float32),
                           [c0, c1, c2, c3])                            # (N,64,64,1)

    to_nchw = lambda a: jnp.transpose(a, (0, 3, 1, 2))
    return to_nchw(eps_est.astype(jnp.float32)), to_nchw(eps), hx


# ----------------------------------------------------------------------------
# Driver
# ----------------------------------------------------------------------------
if __name__ == "__main__":
    key = jax.random.PRNGKey(0)
    k1, k2, k3, k4, k5 = jax.random.split(key, 5)

    batch_sizes = (1, 1)          # PackedSequence: T=2 time steps, batch 1 -> N=2 frames
    N = sum(batch_sizes)
    # The encoder's attn Linear(1808,49) / avgpool(7) force 224x224 spatial inputs and a
    # 64x64 diffusion heatmap; batch is kept small (N=2).
    images = jax.random.normal(k1, (N, 3, 224, 224), jnp.float32)
    head = jax.random.normal(k2, (N, 1, 224, 224), jnp.float32)
    face = jax.random.normal(k3, (N, 3, 224, 224), jnp.float32)
    gt_hm = jax.random.normal(k4, (N, 1, 64, 64), jnp.float32)

    params = init_params(seed=0)

    eps_est, epsilon, hx = gf_diffusion_forward_train(
        params, images, head, face, gt_hm, batch_sizes, k5)

    jax.block_until_ready((eps_est, epsilon, hx))
    assert eps_est.shape == (N, 1, 64, 64)
    assert epsilon.shape == (N, 1, 64, 64)
    print("KERNEL_OK")
</pallas_src>

<mosaic_0001>
module attributes {stable_mosaic.version = 11 : i64} {
  func.func @_matmul_kernel(%arg0: i32, %arg1: i32, %arg2: i32, %arg3: memref<512x147xbf16, #tpu.memory_space<vmem>>, %arg4: memref<147x64xbf16, #tpu.memory_space<vmem>>, %arg5: memref<512x64xbf16, #tpu.memory_space<vmem>>, %arg6: memref<1x1x64xf32, #tpu.memory_space<vmem>>, %arg7: memref<1x1x64xf32, #tpu.memory_space<vmem>>, %arg8: memref<512x64xf32, #tpu.memory_space<vmem>>) attributes {dimension_semantics = [#tpu.dimension_semantics<parallel>, #tpu.dimension_semantics<parallel>, #tpu.dimension_semantics<arbitrary>], iteration_bounds = array<i64: 49, 1, 1>, scalar_prefetch = 0 : i64, scratch_operands = 1 : i64, tpu.core_type = #tpu.core_type<tc>, window_params = [{transform_indices = @transform_0, window_bounds = array<i64: 512, 147>}, {transform_indices = @transform_1, window_bounds = array<i64: 147, 64>}, {transform_indices = @transform_2, window_bounds = array<i64: 512, 64>}, {transform_indices = @transform_3, window_bounds = array<i64: 1, 1, 64>}, {transform_indices = @transform_4, window_bounds = array<i64: 1, 1, 64>}]} {
    %c0_i32 = arith.constant 0 : i32
    %0 = arith.cmpi eq, %arg2, %c0_i32 : i32
    %1 = arith.extui %0 : i1 to i32
    %c0_i32_0 = arith.constant 0 : i32
    %2 = arith.cmpi ne, %1, %c0_i32_0 : i32
    scf.if %2 {
      %cst_10 = arith.constant 0.000000e+00 : f32
      %12 = vector.broadcast %cst_10 : f32 to vector<512x64xf32>
      %c0_11 = arith.constant 0 : index
      %c0_12 = arith.constant 0 : index
      %13 = vector.load %arg8[%c0_11, %c0_12] : memref<512x64xf32, #tpu.memory_space<vmem>>, vector<512x64xf32>
      tpu.vector_store %arg8[%c0_11, %c0_12], %12 {strides = array<i32>} : memref<512x64xf32, #tpu.memory_space<vmem>>, vector<512x64xf32>,
    } else {
    }
    %c0 = arith.constant 0 : index
    %c0_1 = arith.constant 0 : index
    %3 = vector.load %arg8[%c0, %c0_1] : memref<512x64xf32, #tpu.memory_space<vmem>>, vector<512x64xf32>
    %c0_2 = arith.constant 0 : index
    %c0_3 = arith.constant 0 : index
    %4 = vector.load %arg3[%c0_2, %c0_3] : memref<512x147xbf16, #tpu.memory_space<vmem>>, vector<512x147xbf16>
    %c0_4 = arith.constant 0 : index
    %c0_5 = arith.constant 0 : index
    %5 = vector.load %arg4[%c0_4, %c0_5] : memref<147x64xbf16, #tpu.memory_space<vmem>>, vector<147x64xbf16>
    %cst = arith.constant dense<0.000000e+00> : vector<512x64xf32>
    %6 = tpu.matmul %4, %5, %cst {dimension_numbers = #tpu.dot_dimension_numbers<[1], [0], [0], [1], [0, 0, 1, 1], [], []>} : vector<512x147xbf16>, vector<147x64xbf16>, vector<512x64xf32> -> vector<512x64xf32>
    %7 = arith.addf %3, %6 : vector<512x64xf32>
    %c0_6 = arith.constant 0 : index
    %c0_7 = arith.constant 0 : index
    %8 = vector.load %arg8[%c0_6, %c0_7] : memref<512x64xf32, #tpu.memory_space<vmem>>, vector<512x64xf32>
    tpu.vector_store %arg8[%c0_6, %c0_7], %7 {strides = array<i32>} : memref<512x64xf32, #tpu.memory_space<vmem>>, vector<512x64xf32>,
    %c0_i32_8 = arith.constant 0 : i32
    %9 = arith.cmpi eq, %arg2, %c0_i32_8 : i32
    %10 = arith.extui %9 : i1 to i32
    %c0_i32_9 = arith.constant 0 : i32
    %11 = arith.cmpi ne, %10, %c0_i32_9 : i32
    scf.if %11 {
      %c0_10 = arith.constant 0 : index
      %c0_11 = arith.constant 0 : index
      %12 = vector.load %arg8[%c0_10, %c0_11] : memref<512x64xf32, #tpu.memory_space<vmem>>, vector<512x64xf32>
      %13 = arith.truncf %12 : vector<512x64xf32> to vector<512x64xbf16>
      %c0_12 = arith.constant 0 : index
      %c0_13 = arith.constant 0 : index
      %14 = vector.load %arg5[%c0_12, %c0_13] : memref<512x64xbf16, #tpu.memory_space<vmem>>, vector<512x64xbf16>
      tpu.vector_store %arg5[%c0_12, %c0_13], %13 {strides = array<i32>} : memref<512x64xbf16, #tpu.memory_space<vmem>>, vector<512x64xbf16>,
      %cst_14 = arith.constant dense<0.000000e+00> : vector<64xf32>
      %15 = vector.multi_reduction <add>, %12, %cst_14 [0] : vector<512x64xf32> to vector<64xf32>
      %16 = vector.shape_cast %15 : vector<64xf32> to vector<1x64xf32>
      %c0_15 = arith.constant 0 : index
      %c0_16 = arith.constant 0 : index
      %c0_17 = arith.constant 0 : index
      %17 = vector.load %arg6[%c0_15, %c0_16, %c0_17] : memref<1x1x64xf32, #tpu.memory_space<vmem>>, vector<1x1x64xf32>
      %18 = vector.shape_cast %17 : vector<1x1x64xf32> to vector<1x64xf32>
      %19 = vector.shape_cast %16 : vector<1x64xf32> to vector<1x1x64xf32>
      tpu.vector_store %arg6[%c0_15, %c0_16, %c0_17], %19 {strides = array<i32>} : memref<1x1x64xf32, #tpu.memory_space<vmem>>, vector<1x1x64xf32>,
      %20 = arith.mulf %12, %12 : vector<512x64xf32>
      %cst_18 = arith.constant dense<0.000000e+00> : vector<64xf32>
      %21 = vector.multi_reduction <add>, %20, %cst_18 [0] : vector<512x64xf32> to vector<64xf32>
      %22 = vector.shape_cast %21 : vector<64xf32> to vector<1x64xf32>
      %c0_19 = arith.constant 0 : index
      %c0_20 = arith.constant 0 : index
      %c0_21 = arith.constant 0 : index
      %23 = vector.load %arg7[%c0_19, %c0_20, %c0_21] : memref<1x1x64xf32, #tpu.memory_space<vmem>>, vector<1x1x64xf32>
      %24 = vector.shape_cast %23 : vector<1x1x64xf32> to vector<1x64xf32>
      %25 = vector.shape_cast %22 : vector<1x64xf32> to vector<1x1x64xf32>
      tpu.vector_store %arg7[%c0_19, %c0_20, %c0_21], %25 {strides = array<i32>} : memref<1x1x64xf32, #tpu.memory_space<vmem>>, vector<1x1x64xf32>,
    } else {
    }
    return
  }
  func.func @transform_0(%arg0: i32, %arg1: i32, %arg2: i32) -> (i32, i32) {
    %c0_i32 = arith.constant 0 : i32
    return %arg0, %arg2 : i32, i32
  }
  func.func @transform_1(%arg0: i32, %arg1: i32, %arg2: i32) -> (i32, i32) {
    %c0_i32 = arith.constant 0 : i32
    return %arg2, %arg1 : i32, i32
  }
  func.func @transform_2(%arg0: i32, %arg1: i32, %arg2: i32) -> (i32, i32) {
    %c0_i32 = arith.constant 0 : i32
    return %arg0, %arg1 : i32, i32
  }
  func.func @transform_3(%arg0: i32, %arg1: i32, %arg2: i32) -> (i32, i32, i32) {
    %c0_i32 = arith.constant 0 : i32
    %c0_i32_0 = arith.constant 0 : i32
    return %arg0, %c0_i32, %arg1 : i32, i32, i32
  }
  func.func @transform_4(%arg0: i32, %arg1: i32, %arg2: i32) -> (i32, i32, i32) {
    %c0_i32 = arith.constant 0 : i32
    %c0_i32_0 = arith.constant 0 : i32
    return %arg0, %c0_i32, %arg1 : i32, i32, i32
  }
}

</mosaic_0001>

<bundles_post_ra>
// kernel: matmul_pallas.1
= control target key start
LH: loop header
LB: loop body
LE: loop exit
PB: predicated region body
PF: predicated region fallthrough
CT: control target
= control target key end

     0   :  { %10 = vsyncpa [#allocation4], 0  ;;  %s3869_s0 = inlined_call_operand.vmem [shape: bf16[25088,147], index: 0, kind: input, shape index: {}]   ;;  %s3870_s1 = inlined_call_operand.vmem [shape: bf16[147,64], index: 1, kind: input, shape index: {}]   ;;  %s3871_s2 = inlined_call_operand.hbm [shape: bf16[25088,64], index: 2, kind: output, shape index: {0}]   ;;  %s3872_s3 = inlined_call_operand.vmem [shape: f32[49,1,64], index: 3, kind: output, shape index: {1}]   ;;  %s3873_s4 = inlined_call_operand.vmem [shape: f32[49,1,64], index: 4, kind: output, shape index: {2}]  }
   0x1   :  { %12 = vsyncpa [#allocation4 + $0x1], 0  ;;  %s2853_s15 = smov 0   ;;  %s2855_s16 = smov 0  }
   0x2   :  { %s2857_s17 = smov 0   ;;  %s2859_s18 = smov 0  }
   0x3   :  { %s2861_s19 = smov 0   ;;  %s2863_s20 = smov 0  }
   0x4 LB: > { %s2294_s21 = sadd.s32 4294967295, %s2820_s20   ;;  %s2295_s22 = sadd.s32 4294967294, %s2820_s20   ;;  %s2820_s20 = sphi %s2863_s20, %s18_s20   ;;  %s2816_s19 = sphi %s2861_s19, %s3880_s19   ;;  %s2812_s18 = sphi %s2859_s18, %s3879_s18   ;;  %s2808_s17 = sphi %s2857_s17, %s3878_s17   ;;  %s2804_s16 = sphi %s2855_s16, %s3877_s16   ;;  %s2800_s15 = sphi %s2853_s15, %s3876_s15  }
   0x5   : > { %s37_s23 = sadd.s32 1, %s2816_s19  ;;  %s102_s24 = sadd.s32 1, %s2808_s17 }
   0x6   : > { %p39_p0 = scmp.ge.s32.totalorder %s37_s23, 49  ;;  %p112_p1 = scmp.ne.s32.totalorder %s2808_s17, %s2804_s16 }
   0x7   : > { %p113_p2 = scmp.eq.s32.totalorder %s2294_s21, 48  ;;  %p118_p3 = scmp.ne.s32.totalorder %s2804_s16, %s2800_s15 }
   0x8   : > { %s3882_s23 = smov (%p39_p0, %s37_s23), 0  ;;  %p119_p5 = scmp.eq.s32.totalorder %s2295_s22, 48 }
   0x9   : > { %p2893_p4 = por %p113_p2, %p112_p1  ;;  %s97_s26 = ssub.s32 %s2816_s19, %s3882_s23 }
   0xa   : > { %p2299_p6 = scmp.ge.s32.totalorder %s2820_s20, 1  ;;  %p100_p7 = scmp.eq.s32.totalorder %s97_s26, 0 }
   0xb   : > { %p2900_p8 = por %p119_p5, %p118_p3  ;;  %p220_p9 = scmp.lt.s32.totalorder %s2820_s20, 50 }
   0xc   : > { %s2906_s28 = scalar_select %p100_p7, %s2808_s17, %s102_s24  }
   0xd   : > { %p221_p10 = pnand %p2299_p6, %p220_p9 }
   0xe   : > { %v2625_v0 = vld [vmem:[%s3870_s1] sm:$0xff] (!%p221_p10)   ;;  %v2822_v1 = vmov (!%p221_p10), 0   ;;  %v2626_v2 = vld [vmem:[%s3870_s1 + $0x8] sm:$0xff] (!%p221_p10)   ;;  %v2627_v3 = vld [vmem:[%s3870_s1 + $0x10] sm:$0xff] (!%p221_p10)   ;;  %s2301_s9 = sshll.u32 (!%p221_p10), %s2812_s18, 6  ;;  %vm867_vm0 = vcmask (!%p221_p10), 154624  }
   0xf   : > { %224 = sbr.rel (%p221_p10) target bundleno = 493 (0x1ed), region = 28  ;;  %971 = vmatprep.subr.bf16.mxu0 (!%p221_p10), %v2822_v1  ;;  %2545 = vmatprep.subr.bf16.mxu1 (!%p221_p10), %v2822_v1  ;;  %p273_p11 = scmp.lt.s32.totalorder (!%p221_p10), %s2301_s9, 3135  ;;  %v2628_v4 = vld [vmem:[%s3870_s1 + $0x18] sm:$0xff] (!%p221_p10)   ;;  %v2629_v5 = vld [vmem:[%s3870_s1 + $0x20] sm:$0xff] (!%p221_p10)   ;;  %v2630_v7 = vld [vmem:[%s3870_s1 + $0x28] sm:$0xff] (!%p221_p10)   ;;  %vm964_vm1 = vcmask (!%p221_p10), 1040384  }
  0x10   : > { %972 = vmatpush1.bf16.msra.mxu0 (!%p221_p10), %v2625_v0  ;;  %2555 = vmatpush1.bf16.msra.mxu1 (!%p221_p10), %v2625_v0  ;;  %v2631_v8 = vld [vmem:[%s3870_s1 + $0x30] sm:$0xff] (!%p221_p10)   ;;  %v2632_v10 = vld [vmem:[%s3870_s1 + $0x38] sm:$0xff] (!%p221_p10)   ;;  %vm965_vm2 = vcmask (!%p221_p10), 1041408   ;;  %v2823_v11 = vmov (!%p221_p10), 65535   ;;  %v2633_v13 = vld [vmem:[%s3870_s1 + $0x40] sm:$0xff] (!%p221_p10)   ;;  %vm310_vm3 = vcmask (!%p221_p10), 523264  }
  0x11   : > { %973 = vmatprep.subr.bf16.mxu0 (!%p221_p10), %v2822_v1  ;;  %2546 = vmatprep.subr.bf16.mxu1 (!%p221_p10), %v2822_v1  ;;  %v966_v12 = vsel (!%p221_p10), %vm964_vm1, 4294967295, %v2823_v11  ;;  %v2634_v14 = vld [vmem:[%s3870_s1 + $0x48] ss:$0 sps:$4 sm:$0x33] (!%p221_p10)   ;;  %v2824_v17 = vmov (!%p221_p10), 0.0   ;;  %vm1712_vm4 = vcmask (!%p221_p10), 519168  }
  0x12   : > { %v967_v15 = vsel (!%p221_p10), %vm965_vm2, %v966_v12, 0  ;;  %311 = vst.msk [vmem:[#allocation2] sm:$0xff] (!%p221_p10), %vm310_vm3, %v2824_v17  ;;  %312 = vst.msk [vmem:[#allocation2 + $0x8] sm:$0xff] (!%p221_p10), %vm310_vm3, %v2824_v17  ;;  %s2825_s6 = smov (!%p221_p10), [#allocation3]  }
  0x13   : > { %v2966_v16 = vand.u32 (!%p221_p10), %v2634_v14, %v967_v15  ;;  %313 = vst.msk [vmem:[#allocation2 + $0x10] sm:$0xff] (!%p221_p10), %vm310_vm3, %v2824_v17  ;;  %314 = vst.msk [vmem:[#allocation2 + $0x18] sm:$0xff] (!%p221_p10), %vm310_vm3, %v2824_v17  ;;  %s2746_s7 = sshll.u32 (!%p221_p10), %s2825_s6, 4  ;;  %s2747_s7 = int_to_ptr.vmem [resolvable:$false] %s2746_s7 }
  0x14   : > { %974 = vmatpush1.bf16.msra.mxu0 (!%p221_p10), %v2626_v2  ;;  %2556 = vmatpush1.bf16.msra.mxu1 (!%p221_p10), %v2626_v2  ;;  %315 = vst.msk [vmem:[#allocation2 + $0x20] sm:$0xff] (!%p221_p10), %vm310_vm3, %v2824_v17  ;;  %316 = vst.msk [vmem:[#allocation2 + $0x28] sm:$0xff] (!%p221_p10), %vm310_vm3, %v2824_v17  ;;  %s2748_s8 = scalar_lea.vmem (!%p221_p10), %s2747_s7, 8192 }
  0x15   : > { %975 = vmatprep.subr.bf16.mxu0 (!%p221_p10), %v2822_v1  ;;  %2547 = vmatprep.subr.bf16.mxu1 (!%p221_p10), %v2822_v1  ;;  %317 = vst.msk [vmem:[#allocation2 + $0x30] sm:$0xff] (!%p221_p10), %vm310_vm3, %v2824_v17  ;;  %318 = vst.msk [vmem:[#allocation2 + $0x38] sm:$0xff] (!%p221_p10), %vm310_vm3, %v2824_v17 }
  0x16   : > { %s3884_s9 = smov (!%p273_p11, %s2301_s9), 3135  ;;  %319 = vst.msk [vmem:[#allocation2 + $0x40] sm:$0xff] %vm310_vm3, %v2824_v17  ;;  %320 = vst.msk [vmem:[#allocation2 + $0x48] sm:$0xff] %vm310_vm3, %v2824_v17 }
  0x17   : > { %s2479_s12 = sshll.u32 %s3884_s9, 3  ;;  %321 = vst.msk [vmem:[#allocation2 + $0x50] sm:$0xff] %vm310_vm3, %v2824_v17  ;;  %322 = vst.msk [vmem:[#allocation2 + $0x58] sm:$0xff] %vm310_vm3, %v2824_v17 }
  0x18   : > { %976 = vmatpush1.bf16.msra.mxu0 %v2627_v3  ;;  %2557 = vmatpush1.bf16.msra.mxu1 %v2627_v3  ;;  %s2932_s21 = scalar_lea.vmem %s3869_s0, %s2479_s12  ;;  %323 = vst.msk [vmem:[#allocation2 + $0x60] sm:$0xff] %vm310_vm3, %v2824_v17  ;;  %324 = vst.msk [vmem:[#allocation2 + $0x68] sm:$0xff] %vm310_vm3, %v2824_v17  ;;  %s252_s12 = sand.u32 1, %s2804_s16  }
  0x19   : > { %977 = vmatprep.subr.bf16.mxu0 %v2822_v1  ;;  %2548 = vmatprep.subr.bf16.mxu1 %v2822_v1  ;;  %v2637_v6 = vld [vmem:[%s2932_s21 + $0x4] ss:$8 sps:$4 sm:$0xff]   ;;  %325 = vst.msk [vmem:[#allocation2 + $0x70] sm:$0xff] %vm310_vm3, %v2824_v17  ;;  %326 = vst.msk [vmem:[#allocation2 + $0x78] sm:$0xff] %vm310_vm3, %v2824_v17  ;;  %v2635_v18 = vld [vmem:[%s2932_s21] ss:$8 sps:$4 sm:$0xff]  }
  0x1a   : > { %2378 = vmatprep.mubr.msk.bf16.mxu0 %vm867_vm0, %v2637_v6  ;;  %v2661_v9 = vld [vmem:[%s2932_s21 + $0x104] ss:$8 sps:$4 sm:$0xff]   ;;  %327 = vst.msk [vmem:[#allocation2 + $0x80] sm:$0xff] %vm310_vm3, %v2824_v17  ;;  %328 = vst.msk [vmem:[#allocation2 + $0x88] sm:$0xff] %vm310_vm3, %v2824_v17  ;;  %v2638_v19 = vld [vmem:[%s2932_s21 + $0x14] ss:$8 sps:$4 sm:$0xff]  }
  0x1b   : > { %2394 = vmatprep.mubr.msk.bf16.mxu1 %vm867_vm0, %v2661_v9  ;;  %329 = vst.msk [vmem:[#allocation2 + $0x90] sm:$0xff] %vm310_vm3, %v2824_v17  ;;  %330 = vst.msk [vmem:[#allocation2 + $0x98] sm:$0xff] %vm310_vm3, %v2824_v17  ;;  %v2659_v20 = vld [vmem:[%s2932_s21 + $0x100] ss:$8 sps:$4 sm:$0xff]   ;;  %v2665_v21 = vld [vmem:[%s2932_s21 + $0x114] ss:$8 sps:$4 sm:$0xff]  }
  0x1c   : > { %978 = vmatpush1.bf16.msra.mxu0 %v2628_v4  ;;  %2558 = vmatpush1.bf16.msra.mxu1 %v2628_v4  ;;  %331 = vst.msk [vmem:[#allocation2 + $0xa0] sm:$0xff] %vm310_vm3, %v2824_v17  ;;  %332 = vst.msk [vmem:[#allocation2 + $0xa8] sm:$0xff] %vm310_vm3, %v2824_v17  ;;  %v2640_v22 = vld [vmem:[%s2932_s21 + $0x10] ss:$8 sps:$4 sm:$0xff]   ;;  %v2641_v23 = vld [vmem:[%s2932_s21 + $0x24] ss:$8 sps:$4 sm:$0xff]  }
  0x1d   : > { %979 = vmatprep.subr.bf16.mxu0 %v2822_v1  ;;  %2549 = vmatprep.subr.bf16.mxu1 %v2822_v1  ;;  %333 = vst.msk [vmem:[#allocation2 + $0xb0] sm:$0xff] %vm310_vm3, %v2824_v17  ;;  %334 = vst.msk [vmem:[#allocation2 + $0xb8] sm:$0xff] %vm310_vm3, %v2824_v17  ;;  %v2667_v24 = vld [vmem:[%s2932_s21 + $0x110] ss:$8 sps:$4 sm:$0xff]   ;;  %v2671_v25 = vld [vmem:[%s2932_s21 + $0x124] ss:$8 sps:$4 sm:$0xff]  }
  0x1e   : > { %335 = vst.msk [vmem:[#allocation2 + $0xc0] sm:$0xff] %vm310_vm3, %v2824_v17  ;;  %336 = vst.msk [vmem:[#allocation2 + $0xc8] sm:$0xff] %vm310_vm3, %v2824_v17  ;;  %v2643_v26 = vld [vmem:[%s2932_s21 + $0x20] ss:$8 sps:$4 sm:$0xff]   ;;  %v2644_v27 = vld [vmem:[%s2932_s21 + $0x34] ss:$8 sps:$4 sm:$0xff]  }
  0x1f   : > { %337 = vst.msk [vmem:[#allocation2 + $0xd0] sm:$0xff] %vm310_vm3, %v2824_v17  ;;  %338 = vst.msk [vmem:[#allocation2 + $0xd8] sm:$0xff] %vm310_vm3, %v2824_v17  ;;  %v2673_v28 = vld [vmem:[%s2932_s21 + $0x120] ss:$8 sps:$4 sm:$0xff]   ;;  %v2677_v29 = vld [vmem:[%s2932_s21 + $0x134] ss:$8 sps:$4 sm:$0xff]  }
  0x20   : > { %980 = vmatpush1.bf16.msra.mxu0 %v2629_v5  ;;  %2559 = vmatpush1.bf16.msra.mxu1 %v2629_v5  ;;  %339 = vst.msk [vmem:[#allocation2 + $0xe0] sm:$0xff] %vm310_vm3, %v2824_v17  ;;  %340 = vst.msk [vmem:[#allocation2 + $0xe8] sm:$0xff] %vm310_vm3, %v2824_v17  ;;  %v2646_v30 = vld [vmem:[%s2932_s21 + $0x30] ss:$8 sps:$4 sm:$0xff]   ;;  %v2647_v32 = vld [vmem:[%s2932_s21 + $0x44] ss:$8 sps:$4 sm:$0xff]  }
  0x21   : > { %981 = vmatprep.subr.bf16.mxu0 %v2822_v1  ;;  %2550 = vmatprep.subr.bf16.mxu1 %v2822_v1  ;;  %341 = vst.msk [vmem:[#allocation2 + $0xf0] sm:$0xff] %vm310_vm3, %v2824_v17  ;;  %342 = vst.msk [vmem:[#allocation2 + $0xf8] sm:$0xff] %vm310_vm3, %v2824_v17  ;;  %v2679_v31 = vld [vmem:[%s2932_s21 + $0x130] ss:$8 sps:$4 sm:$0xff]   ;;  %v2683_v33 = vld [vmem:[%s2932_s21 + $0x144] ss:$8 sps:$4 sm:$0xff]  }
  0x22   : > { %343 = vst.msk [vmem:[#allocation2 + $0x100] sm:$0xff] %vm310_vm3, %v2824_v17  ;;  %344 = vst.msk [vmem:[#allocation2 + $0x108] sm:$0xff] %vm310_vm3, %v2824_v17  ;;  %v2649_v34 = vld [vmem:[%s2932_s21 + $0x40] ss:$8 sps:$4 sm:$0xff]   ;;  %v2650_v36 = vld [vmem:[%s2932_s21 + $0x54] ss:$8 sps:$4 sm:$0xff]  }
  0x23   : > { %345 = vst.msk [vmem:[#allocation2 + $0x110] sm:$0xff] %vm310_vm3, %v2824_v17  ;;  %346 = vst.msk [vmem:[#allocation2 + $0x118] sm:$0xff] %vm310_vm3, %v2824_v17  ;;  %v2685_v35 = vld [vmem:[%s2932_s21 + $0x140] ss:$8 sps:$4 sm:$0xff]   ;;  %v2689_v37 = vld [vmem:[%s2932_s21 + $0x154] ss:$8 sps:$4 sm:$0xff]  }
  0x24   : > { %982 = vmatpush1.bf16.msra.mxu0 %v2630_v7  ;;  %2560 = vmatpush1.bf16.msra.mxu1 %v2630_v7  ;;  %347 = vst.msk [vmem:[#allocation2 + $0x120] sm:$0xff] %vm310_vm3, %v2824_v17  ;;  %348 = vst.msk [vmem:[#allocation2 + $0x128] sm:$0xff] %vm310_vm3, %v2824_v17  ;;  %v2652_v38 = vld [vmem:[%s2932_s21 + $0x50] ss:$8 sps:$4 sm:$0xff]   ;;  %v2653_v40 = vld [vmem:[%s2932_s21 + $0x64] ss:$8 sps:$4 sm:$0xff]  }
  0x25   : > { %983 = vmatprep.subr.bf16.mxu0 %v2822_v1  ;;  %2551 = vmatprep.subr.bf16.mxu1 %v2822_v1  ;;  %349 = vst.msk [vmem:[#allocation2 + $0x130] sm:$0xff] %vm310_vm3, %v2824_v17  ;;  %350 = vst.msk [vmem:[#allocation2 + $0x138] sm:$0xff] %vm310_vm3, %v2824_v17  ;;  %v2691_v39 = vld [vmem:[%s2932_s21 + $0x150] ss:$8 sps:$4 sm:$0xff]   ;;  %v2695_v41 = vld [vmem:[%s2932_s21 + $0x164] ss:$8 sps:$4 sm:$0xff]  }
  0x26   : > { %351 = vst.msk [vmem:[#allocation2 + $0x140] sm:$0xff] %vm310_vm3, %v2824_v17  ;;  %352 = vst.msk [vmem:[#allocation2 + $0x148] sm:$0xff] %vm310_vm3, %v2824_v17  ;;  %v2655_v42 = vld [vmem:[%s2932_s21 + $0x60] ss:$8 sps:$4 sm:$0xff]   ;;  %v2656_v44 = vld [vmem:[%s2932_s21 + $0x74] ss:$8 sps:$4 sm:$0xff]  }
  0x27   : > { %353 = vst.msk [vmem:[#allocation2 + $0x150] sm:$0xff] %vm310_vm3, %v2824_v17  ;;  %354 = vst.msk [vmem:[#allocation2 + $0x158] sm:$0xff] %vm310_vm3, %v2824_v17  ;;  %v2697_v43 = vld [vmem:[%s2932_s21 + $0x160] ss:$8 sps:$4 sm:$0xff]   ;;  %v2701_v45 = vld [vmem:[%s2932_s21 + $0x174] ss:$8 sps:$4 sm:$0xff]  }
  0x28   : > { %984 = vmatpush1.bf16.msra.mxu0 %v2631_v8  ;;  %2561 = vmatpush1.bf16.msra.mxu1 %v2631_v8  ;;  %355 = vst.msk [vmem:[#allocation2 + $0x160] sm:$0xff] %vm310_vm3, %v2824_v17  ;;  %356 = vst.msk [vmem:[#allocation2 + $0x168] sm:$0xff] %vm310_vm3, %v2824_v17  ;;  %v2658_v46 = vld [vmem:[%s2932_s21 + $0x70] ss:$8 sps:$4 sm:$0xff]   ;;  %v2662_v48 = vld [vmem:[%s2932_s21 + $0x84] ss:$8 sps:$4 sm:$0xff]  }
  0x29   : > { %985 = vmatprep.subr.bf16.mxu0 %v2822_v1  ;;  %2552 = vmatprep.subr.bf16.mxu1 %v2822_v1  ;;  %357 = vst.msk [vmem:[#allocation2 + $0x170] sm:$0xff] %vm310_vm3, %v2824_v17  ;;  %358 = vst.msk [vmem:[#allocation2 + $0x178] sm:$0xff] %vm310_vm3, %v2824_v17  ;;  %v2703_v47 = vld [vmem:[%s2932_s21 + $0x170] ss:$8 sps:$4 sm:$0xff]   ;;  %v2707_v49 = vld [vmem:[%s2932_s21 + $0x184] ss:$8 sps:$4 sm:$0xff]  }
  0x2a   : > { %359 = vst.msk [vmem:[#allocation2 + $0x180] sm:$0xff] %vm310_vm3, %v2824_v17  ;;  %360 = vst.msk [vmem:[#allocation2 + $0x188] sm:$0xff] %vm310_vm3, %v2824_v17  ;;  %v2664_v50 = vld [vmem:[%s2932_s21 + $0x80] ss:$8 sps:$4 sm:$0xff]   ;;  %v2668_v52 = vld [vmem:[%s2932_s21 + $0x94] ss:$8 sps:$4 sm:$0xff]  }
  0x2b   : > { %361 = vst.msk [vmem:[#allocation2 + $0x190] sm:$0xff] %vm310_vm3, %v2824_v17  ;;  %362 = vst.msk [vmem:[#allocation2 + $0x198] sm:$0xff] %vm310_vm3, %v2824_v17  ;;  %v2709_v51 = vld [vmem:[%s2932_s21 + $0x180] ss:$8 sps:$4 sm:$0xff]   ;;  %v2710_v53 = vld [vmem:[%s2932_s21 + $0x194] ss:$8 sps:$4 sm:$0xff]  }
  0x2c   : > { %986 = vmatpush1.bf16.msra.mxu0 %v2632_v10  ;;  %2562 = vmatpush1.bf16.msra.mxu1 %v2632_v10  ;;  %363 = vst.msk [vmem:[#allocation2 + $0x1a0] sm:$0xff] %vm310_vm3, %v2824_v17  ;;  %364 = vst.msk [vmem:[#allocation2 + $0x1a8] sm:$0xff] %vm310_vm3, %v2824_v17  ;;  %v2670_v54 = vld [vmem:[%s2932_s21 + $0x90] ss:$8 sps:$4 sm:$0xff]   ;;  %v2674_v56 = vld [vmem:[%s2932_s21 + $0xa4] ss:$8 sps:$4 sm:$0xff]  }
  0x2d   : > { %987 = vmatprep.subr.bf16.mxu0 %v2822_v1  ;;  %2553 = vmatprep.subr.bf16.mxu1 %v2822_v1  ;;  %365 = vst.msk [vmem:[#allocation2 + $0x1b0] sm:$0xff] %vm310_vm3, %v2824_v17  ;;  %366 = vst.msk [vmem:[#allocation2 + $0x1b8] sm:$0xff] %vm310_vm3, %v2824_v17  ;;  %v2712_v55 = vld [vmem:[%s2932_s21 + $0x190] ss:$8 sps:$4 sm:$0xff]   ;;  %v2713_v57 = vld [vmem:[%s2932_s21 + $0x1a4] ss:$8 sps:$4 sm:$0xff]  }
  0x2e   : > { %367 = vst.msk [vmem:[#allocation2 + $0x1c0] sm:$0xff] %vm310_vm3, %v2824_v17  ;;  %368 = vst.msk [vmem:[#allocation2 + $0x1c8] sm:$0xff] %vm310_vm3, %v2824_v17  ;;  %v2676_v58 = vld [vmem:[%s2932_s21 + $0xa0] ss:$8 sps:$4 sm:$0xff]   ;;  %v2680_v60 = vld [vmem:[%s2932_s21 + $0xb4] ss:$8 sps:$4 sm:$0xff]  }
  0x2f   : > { %369 = vst.msk [vmem:[#allocation2 + $0x1d0] sm:$0xff] %vm310_vm3, %v2824_v17  ;;  %370 = vst.msk [vmem:[#allocation2 + $0x1d8] sm:$0xff] %vm310_vm3, %v2824_v17  ;;  %v2715_v59 = vld [vmem:[%s2932_s21 + $0x1a0] ss:$8 sps:$4 sm:$0xff]   ;;  %v2716_v61 = vld [vmem:[%s2932_s21 + $0x1b4] ss:$8 sps:$4 sm:$0xff]  }
  0x30   : > { %988 = vmatpush1.bf16.msra.mxu0 %v2633_v13  ;;  %2563 = vmatpush1.bf16.msra.mxu1 %v2633_v13  ;;  %371 = vst.msk [vmem:[#allocation2 + $0x1e0] sm:$0xff] %vm310_vm3, %v2824_v17  ;;  %372 = vst.msk [vmem:[#allocation2 + $0x1e8] sm:$0xff] %vm310_vm3, %v2824_v17  ;;  %v2682_v62 = vld [vmem:[%s2932_s21 + $0xb0] ss:$8 sps:$4 sm:$0xff]   ;;  %v2686_v0 = vld [vmem:[%s2932_s21 + $0xc4] ss:$8 sps:$4 sm:$0xff]  }
  0x31   : > { %989 = vmatprep.subr.bf16.mxu0 %v2822_v1  ;;  %2554 = vmatprep.subr.bf16.mxu1 %v2822_v1  ;;  %373 = vst.msk [vmem:[#allocation2 + $0x1f0] sm:$0xff] %vm310_vm3, %v2824_v17  ;;  %374 = vst.msk [vmem:[#allocation2 + $0x1f8] sm:$0xff] %vm310_vm3, %v2824_v17  ;;  %v2718_v63 = vld [vmem:[%s2932_s21 + $0x1b0] ss:$8 sps:$4 sm:$0xff]   ;;  %v2719_v1 = vld [vmem:[%s2932_s21 + $0x1c4] ss:$8 sps:$4 sm:$0xff]  }
  0x32   : > { %v2688_v2 = vld [vmem:[%s2932_s21 + $0xc0] ss:$8 sps:$4 sm:$0xff]   ;;  %v2692_v4 = vld [vmem:[%s2932_s21 + $0xd4] ss:$8 sps:$4 sm:$0xff]   ;;  %v2694_v6 = vld [vmem:[%s2932_s21 + $0xd0] ss:$8 sps:$4 sm:$0xff]  }
  0x33   : > { %v2721_v3 = vld [vmem:[%s2932_s21 + $0x1c0] ss:$8 sps:$4 sm:$0xff]   ;;  %v2722_v5 = vld [vmem:[%s2932_s21 + $0x1d4] ss:$8 sps:$4 sm:$0xff]   ;;  %v2724_v7 = vld [vmem:[%s2932_s21 + $0x1d0] ss:$8 sps:$4 sm:$0xff]  }
  0x34   : > { %990 = vmatpush1.bf16.msra.mxu0 %v2966_v16  ;;  %2564 = vmatpush1.bf16.msra.mxu1 %v2966_v16  ;;  %v2698_v8 = vld [vmem:[%s2932_s21 + $0xe4] ss:$8 sps:$4 sm:$0xff]   ;;  %v2700_v10 = vld [vmem:[%s2932_s21 + $0xe0] ss:$8 sps:$4 sm:$0xff]   ;;  %v2704_v12 = vld [vmem:[%s2932_s21 + $0xf4] ss:$8 sps:$4 sm:$0xff]  }
  0x35   : > { %v2725_v9 = vld [vmem:[%s2932_s21 + $0x1e4] ss:$8 sps:$4 sm:$0xff]   ;;  %v2727_v11 = vld [vmem:[%s2932_s21 + $0x1e0] ss:$8 sps:$4 sm:$0xff]   ;;  %v2728_v13 = vld [vmem:[%s2932_s21 + $0x1f4] ss:$8 sps:$4 sm:$0xff]  }
  0x36   : > { %v2706_v14 = vld [vmem:[%s2932_s21 + $0xf0] ss:$8 sps:$4 sm:$0xff]   ;;  %v375_v16 = vld [vmem:[#allocation2] sm:$0xff]  ;;  %s2300_s13 = sshll.u32 %s252_s12, 8  ;;  %s3693_s30 = scalar_lea.sflag [#allocation4], %s252_s12 }
  0x37   : > { %1004 = vmatmul.mubr.bf16.vlgmr.msra.gmra.mrb[0].mxu0 %v2635_v18  ;;  %1132 = vmatmul.mubr.bf16.vlgmr.msra.gmra.mrb[0].mxu1 %v2659_v20  ;;  %v2730_v15 = vld [vmem:[%s2932_s21 + $0x1f0] ss:$8 sps:$4 sm:$0xff]   ;;  %v407_v17 = vld [vmem:[#allocation2 + $0x100] sm:$0xff]  ;;  %s3207_s14 = scalar_lea.vmem [#allocation3], %s2300_s13  ;;  %s2544_s21 = sshll.u32 %s2812_s18, 12 }
  0x38   : > { %2379 = vmatprep.mubr.msk.bf16.mxu0 %vm867_vm0, %v2638_v19  ;;  %2395 = vmatprep.mubr.msk.bf16.mxu1 %vm867_vm0, %v2665_v21  ;;  %v376_v19 = vld [vmem:[#allocation2 + $0x8] sm:$0xff]  ;;  %s2137_s22 = sshll.u32 %s3207_s14, 4  ;;  %s3679_s29 = scalar_lea.hbm %s3871_s2, %s2544_s21  ;;  %s3681_s22 = int_to_ptr.vmem [resolvable:$true] %s2137_s22 }
  0x39   : > { %v408_v21 = vld [vmem:[#allocation2 + $0x108] sm:$0xff]  ;;  %s2742_s5 = scalar_lea.vmem %s3681_s22, 4096  ;;  %p2749_p1 = scmp.lt.s32.totalorder %s3681_s22, %s2747_s7 }
  0x3a   : > { %p2743_p12 = scmp.ne.s32.totalorder %s3681_s22, %s2742_s5  ;;  %p2750_p2 = scmp.lt.s32.totalorder %s2748_s8, %s2742_s5 }
  0x3c   : > { %p2744_p13 = pnand %p2743_p12, %p2893_p4  ;;  %p2751_p3 = por %p2750_p2, %p2749_p1 }
  0x3e   : > { %p2745_p0 = pneg %p2744_p13 }
  0x3f   : > { %1012 = vmatmul.mubr.bf16.gmra.mrb[4].mxu0 %v2640_v22  ;;  %1140 = vmatmul.mubr.bf16.gmra.mrb[4].mxu1 %v2667_v24 }
  0x40   : > { %2380 = vmatprep.mubr.msk.bf16.mxu0 %vm867_vm0, %v2641_v23  ;;  %2396 = vmatprep.mubr.msk.bf16.mxu1 %vm867_vm0, %v2671_v25  ;;  %p2752_p5 = pnand %p2751_p3, %p2745_p0 }
  0x47   : > { %1020 = vmatmul.mubr.bf16.gmra.mrb[8].mxu0 %v2643_v26  ;;  %1148 = vmatmul.mubr.bf16.gmra.mrb[8].mxu1 %v2673_v28 }
  0x48   : > { %2381 = vmatprep.mubr.msk.bf16.mxu0 %vm867_vm0, %v2644_v27  ;;  %2397 = vmatprep.mubr.msk.bf16.mxu1 %vm867_vm0, %v2677_v29 }
  0x4f   : > { %1028 = vmatmul.mubr.bf16.gmra.mrb[12].mxu0 %v2646_v30  ;;  %1156 = vmatmul.mubr.bf16.gmra.mrb[12].mxu1 %v2679_v31 }
  0x50   : > { %2382 = vmatprep.mubr.msk.bf16.mxu0 %vm867_vm0, %v2647_v32  ;;  %2398 = vmatprep.mubr.msk.bf16.mxu1 %vm867_vm0, %v2683_v33  ;;  %v377_v32 = vld [vmem:[#allocation2 + $0x10] sm:$0xff] }
  0x51   : > { %v409_v33 = vld [vmem:[#allocation2 + $0x110] sm:$0xff] }
  0x57   : > { %1036 = vmatmul.mubr.bf16.gmra.mrb[16].mxu0 %v2649_v34  ;;  %1164 = vmatmul.mubr.bf16.gmra.mrb[16].mxu1 %v2685_v35  ;;  %v378_v35 = vld [vmem:[#allocation2 + $0x18] sm:$0xff] }
  0x58   : > { %2383 = vmatprep.mubr.msk.bf16.mxu0 %vm867_vm0, %v2650_v36  ;;  %2399 = vmatprep.mubr.msk.bf16.mxu1 %vm867_vm0, %v2689_v37 }
  0x5f   : > { %1044 = vmatmul.mubr.bf16.gmra.mrb[20].mxu0 %v2652_v38  ;;  %1172 = vmatmul.mubr.bf16.gmra.mrb[20].mxu1 %v2691_v39 }
  0x60   : > { %2384 = vmatprep.mubr.msk.bf16.mxu0 %vm867_vm0, %v2653_v40  ;;  %2400 = vmatprep.mubr.msk.bf16.mxu1 %vm867_vm0, %v2695_v41  ;;  %v410_v41 = vld [vmem:[#allocation2 + $0x118] sm:$0xff] }
  0x67   : > { %1052 = vmatmul.mubr.bf16.gmra.mrb[24].mxu0 %v2655_v42  ;;  %1180 = vmatmul.mubr.bf16.gmra.mrb[24].mxu1 %v2697_v43 }
  0x68   : > { %2385 = vmatprep.mubr.msk.bf16.mxu0 %vm867_vm0, %v2656_v44  ;;  %2401 = vmatprep.mubr.msk.bf16.mxu1 %vm867_vm0, %v2701_v45 }
  0x6f   : > { %1060 = vmatmul.mubr.bf16.gmra.mrb[28].mxu0 %v2658_v46  ;;  %1188 = vmatmul.mubr.bf16.gmra.mrb[28].mxu1 %v2703_v47 }
  0x70   : > { %2386 = vmatprep.mubr.msk.bf16.mxu0 %vm867_vm0, %v2662_v48  ;;  %2402 = vmatprep.mubr.msk.bf16.mxu1 %vm867_vm0, %v2707_v49 }
  0x77   : > { %1068 = vmatmul.mubr.bf16.gmra.mrb[32].mxu0 %v2664_v50  ;;  %1196 = vmatmul.mubr.bf16.gmra.mrb[32].mxu1 %v2709_v51 }
  0x78   : > { %2387 = vmatprep.mubr.msk.bf16.mxu0 %vm867_vm0, %v2668_v52  ;;  %2403 = vmatprep.mubr.msk.bf16.mxu1 %vm867_vm0, %v2710_v53 }
  0x7f   : > { %1076 = vmatmul.mubr.bf16.gmra.mrb[36].mxu0 %v2670_v54  ;;  %1204 = vmatmul.mubr.bf16.gmra.mrb[36].mxu1 %v2712_v55  ;;  %v379_v55 = vld [vmem:[#allocation2 + $0x20] sm:$0xff] }
  0x80   : > { %2388 = vmatprep.mubr.msk.bf16.mxu0 %vm867_vm0, %v2674_v56  ;;  %2404 = vmatprep.mubr.msk.bf16.mxu1 %vm867_vm0, %v2713_v57  ;;  %v411_v57 = vld [vmem:[#allocation2 + $0x120] sm:$0xff] }
  0x87   : > { %1084 = vmatmul.mubr.bf16.gmra.mrb[40].mxu0 %v2676_v58  ;;  %1212 = vmatmul.mubr.bf16.gmra.mrb[40].mxu1 %v2715_v59  ;;  %v380_v59 = vld [vmem:[#allocation2 + $0x28] sm:$0xff] }
  0x88   : > { %2389 = vmatprep.mubr.msk.bf16.mxu0 %vm867_vm0, %v2680_v60  ;;  %2405 = vmatprep.mubr.msk.bf16.mxu1 %vm867_vm0, %v2716_v61 }
  0x8f   : > { %1092 = vmatmul.mubr.bf16.gmra.mrb[44].mxu0 %v2682_v62  ;;  %1220 = vmatmul.mubr.bf16.gmra.mrb[44].mxu1 %v2718_v63 }
  0x90   : > { %2390 = vmatprep.mubr.msk.bf16.mxu0 %vm867_vm0, %v2686_v0  ;;  %2406 = vmatprep.mubr.msk.bf16.mxu1 %vm867_vm0, %v2719_v1 }
  0x97   : > { %1100 = vmatmul.mubr.bf16.gmra.mrb[48].mxu0 %v2688_v2  ;;  %1228 = vmatmul.mubr.bf16.gmra.mrb[48].mxu1 %v2721_v3 }
  0x98   : > { %2391 = vmatprep.mubr.msk.bf16.mxu0 %vm867_vm0, %v2692_v4  ;;  %2407 = vmatprep.mubr.msk.bf16.mxu1 %vm867_vm0, %v2722_v5 }
  0x9f   : > { %1108 = vmatmul.mubr.bf16.gmra.mrb[52].mxu0 %v2694_v6  ;;  %1236 = vmatmul.mubr.bf16.gmra.mrb[52].mxu1 %v2724_v7 }
  0xa0   : > { %2392 = vmatprep.mubr.msk.bf16.mxu0 %vm867_vm0, %v2698_v8  ;;  %2408 = vmatprep.mubr.msk.bf16.mxu1 %vm867_vm0, %v2725_v9 }
  0xa7   : > { %1116 = vmatmul.mubr.bf16.gmra.mrb[56].mxu0 %v2700_v10  ;;  %1244 = vmatmul.mubr.bf16.gmra.mrb[56].mxu1 %v2727_v11  ;;  %v412_v11 = vld [vmem:[#allocation2 + $0x128] sm:$0xff] }
  0xa8   : > { %2393 = vmatprep.mubr.msk.bf16.mxu0 %vm867_vm0, %v2704_v12  ;;  %2409 = vmatprep.mubr.msk.bf16.mxu1 %vm867_vm0, %v2728_v13 }
  0xaf   : > { %1124 = vmatmul.mubr.bf16.gmra.mrb[60].mxu0 %v2706_v14  ;;  %1252 = vmatmul.mubr.bf16.gmra.mrb[60].mxu1 %v2730_v15  ;;  %v381_v14 = vld [vmem:[#allocation2 + $0x30] sm:$0xff] }
 0x10a   : > { %v1005_v18 = vpop.f32.mrb[0].mxu0  ;;  %v1133_v20 = vpop.f32.mrb[0].mxu1 }
 0x10b   : > { %v1260_v22 = vadd.f32 %v1005_v18, %v375_v16  ;;  %v1007_v23 = vpop.f32.mrb[1].mxu0  ;;  %v1292_v24 = vadd.f32 %v1133_v20, %v407_v17  ;;  %v1135_v25 = vpop.f32.mrb[1].mxu1  ;;  %v413_v16 = vld [vmem:[#allocation2 + $0x130] sm:$0xff] }
 0x10c   : > { %v1008_v26 = vpop.f32.mrb[2].mxu0  ;;  %v1136_v27 = vpop.f32.mrb[2].mxu1 }
 0x10d   : > { %1325 = vst.msk [vmem:[#allocation2] sm:$0xff] %vm310_vm3, %v1260_v22  ;;  %v1261_v28 = vadd.f32 %v1008_v26, %v376_v19  ;;  %v1010_v29 = vpop.f32.mrb[3].mxu0  ;;  %1357 = vst.msk [vmem:[#allocation2 + $0x100] sm:$0xff] %vm310_vm3, %v1292_v24  ;;  %v1293_v30 = vadd.f32 %v1136_v27, %v408_v21  ;;  %v1138_v31 = vpop.f32.mrb[3].mxu1  ;;  %v382_v19 = vld [vmem:[#allocation2 + $0x38] sm:$0xff] }
 0x10f   : > { %1326 = vst.msk [vmem:[#allocation2 + $0x8] sm:$0xff] %vm310_vm3, %v1261_v28  ;;  %1358 = vst.msk [vmem:[#allocation2 + $0x108] sm:$0xff] %vm310_vm3, %v1293_v30 }
 0x112   : > { %v1013_v34 = vpop.f32.mrb[4].mxu0  ;;  %v1141_v36 = vpop.f32.mrb[4].mxu1 }
 0x113   : > { %v1262_v37 = vadd.f32 %v1013_v34, %v377_v32  ;;  %v1015_v38 = vpop.f32.mrb[5].mxu0  ;;  %v1294_v39 = vadd.f32 %v1141_v36, %v409_v33  ;;  %v1143_v40 = vpop.f32.mrb[5].mxu1  ;;  %v414_v32 = vld [vmem:[#allocation2 + $0x138] sm:$0xff] }
 0x114   : > { %v3199_v42 = vld [vmem:[#allocation2] sm:$0xff]  ;;  %v1016_v43 = vpop.f32.mrb[6].mxu0  ;;  %v1144_v45 = vpop.f32.mrb[6].mxu1 }
 0x115   : > { %v1424_v44 = vld [vmem:[#allocation2 + $0x100] sm:$0xff]  ;;  %v2480_v46 = vpack.c.bf16 %v3199_v42, %v3199_v42  ;;  %1327 = vst.msk [vmem:[#allocation2 + $0x10] sm:$0xff] %vm310_vm3, %v1262_v37  ;;  %v1263_v47 = vadd.f32 %v1016_v43, %v378_v35  ;;  %v1018_v48 = vpop.f32.mrb[7].mxu0  ;;  %1359 = vst.msk [vmem:[#allocation2 + $0x110] sm:$0xff] %vm310_vm3, %v1294_v39  ;;  %v1146_v49 = vpop.f32.mrb[7].mxu1  ;;  %v1295_v53 = vadd.f32 %v1144_v45, %v410_v41  ;;  %v384_v41 = vld [vmem:[#allocation2 + $0x48] sm:$0xff] }
 0x116   : > { %v3205_v50 = vld [vmem:[#allocation2 + $0x8] sm:$0xff]  ;;  %v2512_v51 = vpack.c.bf16 %v1424_v44, %v1424_v44  ;;  %v383_v37 = vld [vmem:[#allocation2 + $0x40] sm:$0xff] }
 0x117   : > { %v1425_v52 = vld [vmem:[#allocation2 + $0x108] sm:$0xff]  ;;  %1713 = vst.msk [vmem:[%s3207_s14] sm:$0xf] %vm1712_vm4, %v2480_v46  ;;  %v2481_v54 = vpack.c.bf16 %v3205_v50, %v3205_v50  ;;  %v415_v39 = vld [vmem:[#allocation2 + $0x140] sm:$0xff] }
 0x118   : > { %1328 = vst.msk [vmem:[#allocation2 + $0x18] sm:$0xff] %vm310_vm3, %v1263_v47  ;;  %v2513_v56 = vpack.c.bf16 %v1425_v52, %v1425_v52  ;;  %1360 = vst.msk [vmem:[#allocation2 + $0x118] sm:$0xff] %vm310_vm3, %v1295_v53 }
 0x119   : > { %1745 = vst.msk [vmem:[%s3207_s14 + $0x80] sm:$0xf] %vm1712_vm4, %v2512_v51  ;;  %1714 = vst.msk [vmem:[%s3207_s14 + $0x4] sm:$0xf] %vm1712_vm4, %v2481_v54 }
 0x11a   : > { %v1021_v58 = vpop.f32.mrb[8].mxu0  ;;  %1746 = vst.msk [vmem:[%s3207_s14 + $0x84] sm:$0xf] %vm1712_vm4, %v2513_v56  ;;  %v1149_v60 = vpop.f32.mrb[8].mxu1 }
 0x11b   : > { %v1264_v61 = vadd.f32 %v1021_v58, %v379_v55  ;;  %v1023_v62 = vpop.f32.mrb[9].mxu0  ;;  %v1296_v63 = vadd.f32 %v1149_v60, %v411_v57  ;;  %v1151_v0 = vpop.f32.mrb[9].mxu1  ;;  %v416_v58 = vld [vmem:[#allocation2 + $0x148] sm:$0xff] }
 0x11c   : > { %v3221_v1 = vld [vmem:[#allocation2 + $0x10] sm:$0xff]  ;;  %v1024_v2 = vpop.f32.mrb[10].mxu0  ;;  %v1152_v4 = vpop.f32.mrb[10].mxu1 }
 0x11d   : > { %v1426_v3 = vld [vmem:[#allocation2 + $0x110] sm:$0xff]  ;;  %v2482_v5 = vpack.c.bf16 %v3221_v1, %v3221_v1  ;;  %1329 = vst.msk [vmem:[#allocation2 + $0x20] sm:$0xff] %vm310_vm3, %v1264_v61  ;;  %v1265_v6 = vadd.f32 %v1024_v2, %v380_v59  ;;  %v1026_v7 = vpop.f32.mrb[11].mxu0  ;;  %1361 = vst.msk [vmem:[#allocation2 + $0x120] sm:$0xff] %vm310_vm3, %v1296_v63  ;;  %v1154_v8 = vpop.f32.mrb[11].mxu1  ;;  %v1297_v17 = vadd.f32 %v1152_v4, %v412_v11 }
 0x11e   : > { %v2514_v10 = vpack.c.bf16 %v1426_v3, %v1426_v3  ;;  %v385_v63 = vld [vmem:[#allocation2 + $0x50] sm:$0xff]  ;;  %v1913_v8 = vmul.f32 %v3205_v50, %v3205_v50 }
 0x11f   : > { %v3227_v9 = vld [vmem:[#allocation2 + $0x18] sm:$0xff]  ;;  %1715 = vst.msk [vmem:[%s3207_s14 + $0x8] sm:$0xf] %vm1712_vm4, %v2482_v5  ;;  %v417_v2 = vld [vmem:[#allocation2 + $0x150] sm:$0xff] }
 0x120   : > { %v2483_v12 = vpack.c.bf16 %v3227_v9, %v3227_v9  ;;  %1330 = vst.msk [vmem:[#allocation2 + $0x28] sm:$0xff] %vm310_vm3, %v1265_v6  ;;  %v1427_v13 = vld [vmem:[#allocation2 + $0x118] sm:$0xff]  ;;  %1362 = vst.msk [vmem:[#allocation2 + $0x128] sm:$0xff] %vm310_vm3, %v1297_v17 }
 0x121   : > { %1747 = vst.msk [vmem:[%s3207_s14 + $0x88] sm:$0xf] %vm1712_vm4, %v2514_v10  ;;  %v2515_v15 = vpack.c.bf16 %v1427_v13, %v1427_v13  ;;  %v386_v5 = vld [vmem:[#allocation2 + $0x58] sm:$0xff] }
 0x122   : > { %1716 = vst.msk [vmem:[%s3207_s14 + $0xc] sm:$0xf] %vm1712_vm4, %v2483_v12  ;;  %v1029_v18 = vpop.f32.mrb[12].mxu0  ;;  %v1157_v20 = vpop.f32.mrb[12].mxu1 }
 0x123   : > { %1748 = vst.msk [vmem:[%s3207_s14 + $0x8c] sm:$0xf] %vm1712_vm4, %v2515_v15  ;;  %v1266_v21 = vadd.f32 %v1029_v18, %v381_v14  ;;  %v1031_v22 = vpop.f32.mrb[13].mxu0  ;;  %v1298_v23 = vadd.f32 %v1157_v20, %v413_v16  ;;  %v1159_v24 = vpop.f32.mrb[13].mxu1  ;;  %v1912_v14 = vmul.f32 %v3199_v42, %v3199_v42  ;;  %v1778_v18 = vsel %vm310_vm3, %v3205_v50, 0.0 }
 0x124   : > { %v3241_v25 = vld [vmem:[#allocation2 + $0x20] sm:$0xff]  ;;  %v1032_v26 = vpop.f32.mrb[14].mxu0  ;;  %v1160_v28 = vpop.f32.mrb[14].mxu1  ;;  %v418_v24 = vld [vmem:[#allocation2 + $0x158] sm:$0xff] }
 0x125   : > { %v1428_v27 = vld [vmem:[#allocation2 + $0x120] sm:$0xff]  ;;  %v2484_v29 = vpack.c.bf16 %v3241_v25, %v3241_v25  ;;  %1331 = vst.msk [vmem:[#allocation2 + $0x30] sm:$0xff] %vm310_vm3, %v1266_v21  ;;  %v1267_v30 = vadd.f32 %v1032_v26, %v382_v19  ;;  %v1034_v31 = vpop.f32.mrb[15].mxu0  ;;  %1363 = vst.msk [vmem:[#allocation2 + $0x130] sm:$0xff] %vm310_vm3, %v1298_v23  ;;  %v1162_v33 = vpop.f32.mrb[15].mxu1  ;;  %v1299_v38 = vadd.f32 %v1160_v28, %v414_v32  ;;  %v1777_v28 = vsel %vm310_vm3, %v3199_v42, 0.0 }
 0x126   : > { %v2516_v35 = vpack.c.bf16 %v1428_v27, %v1428_v27  ;;  %v1914_v19 = vmul.f32 %v3221_v1, %v3221_v1  ;;  %v1779_v32 = vadd.f32 %v1778_v18, %v1777_v28  ;;  %v387_v33 = vld [vmem:[#allocation2 + $0x60] sm:$0xff]  ;;  %v1976_v42 = vsel %vm310_vm3, %v1912_v14, 0.0 }
 0x127   : > { %v3247_v34 = vld [vmem:[#allocation2 + $0x28] sm:$0xff]  ;;  %1717 = vst.msk [vmem:[%s3207_s14 + $0x10] sm:$0xf] %vm1712_vm4, %v2484_v29  ;;  %v1977_v29 = vsel %vm310_vm3, %v1913_v8, 0.0 }
 0x128   : > { %v2485_v36 = vpack.c.bf16 %v3247_v34, %v3247_v34  ;;  %1332 = vst.msk [vmem:[#allocation2 + $0x38] sm:$0xff] %vm310_vm3, %v1267_v30  ;;  %v1429_v43 = vld [vmem:[#allocation2 + $0x128] sm:$0xff]  ;;  %1364 = vst.msk [vmem:[#allocation2 + $0x138] sm:$0xff] %vm310_vm3, %v1299_v38  ;;  %v1780_v30 = vsel %vm310_vm3, %v3221_v1, 0.0  ;;  %v1915_v1 = vmul.f32 %v3227_v9, %v3227_v9  ;;  %v1786_v14 = vsel %vm310_vm3, %v3247_v34, 0.0 }
 0x129   : > { %1749 = vst.msk [vmem:[%s3207_s14 + $0x90] sm:$0xf] %vm1712_vm4, %v2516_v35  ;;  %v2517_v47 = vpack.c.bf16 %v1429_v43, %v1429_v43  ;;  %v388_v43 = vld [vmem:[#allocation2 + $0x68] sm:$0xff] }
 0x12a   : > { %1718 = vst.msk [vmem:[%s3207_s14 + $0x14] sm:$0xf] %vm1712_vm4, %v2485_v36  ;;  %v1037_v40 = vpop.f32.mrb[16].mxu0  ;;  %v1165_v44 = vpop.f32.mrb[16].mxu1  ;;  %v419_v36 = vld [vmem:[#allocation2 + $0x160] sm:$0xff] }
 0x12b   : > { %v1268_v45 = vadd.f32 %v1037_v40, %v383_v37  ;;  %v1039_v46 = vpop.f32.mrb[17].mxu0  ;;  %v1167_v48 = vpop.f32.mrb[17].mxu1  ;;  %v1300_v53 = vadd.f32 %v1165_v44, %v415_v39  ;;  %1750 = vst.msk [vmem:[%s3207_s14 + $0x94] sm:$0xf] %vm1712_vm4, %v2517_v47  ;;  %v1979_v37 = vsel %vm310_vm3, %v1914_v19, 0.0  ;;  %v1978_v39 = vadd.f32 %v1977_v29, %v1976_v42 }
 0x12c   : > { %v3259_v49 = vld [vmem:[#allocation2 + $0x30] sm:$0xff]  ;;  %v1040_v51 = vpop.f32.mrb[18].mxu0  ;;  %v1168_v54 = vpop.f32.mrb[18].mxu1  ;;  %v1781_v40 = vadd.f32 %v1780_v30, %v1779_v32  ;;  %v1782_v46 = vsel %vm310_vm3, %v3227_v9, 0.0  ;;  %v1916_v47 = vmul.f32 %v3241_v25, %v3241_v25  ;;  %v1784_v9 = vsel %vm310_vm3, %v3241_v25, 0.0 }
 0x12d   : > { %v1430_v52 = vld [vmem:[#allocation2 + $0x130] sm:$0xff]  ;;  %v2486_v55 = vpack.c.bf16 %v3259_v49, %v3259_v49  ;;  %1333 = vst.msk [vmem:[#allocation2 + $0x40] sm:$0xff] %vm310_vm3, %v1268_v45  ;;  %v1269_v56 = vadd.f32 %v1040_v51, %v384_v41  ;;  %v1042_v57 = vpop.f32.mrb[19].mxu0  ;;  %v1170_v59 = vpop.f32.mrb[19].mxu1  ;;  %1365 = vst.msk [vmem:[#allocation2 + $0x140] sm:$0xff] %vm310_vm3, %v1300_v53  ;;  %v1301_v0 = vadd.f32 %v1168_v54, %v416_v58 }
 0x12e   : > { %v2518_v61 = vpack.c.bf16 %v1430_v52, %v1430_v52  ;;  %v1980_v54 = vadd.f32 %v1979_v37, %v1978_v39  ;;  %v1981_v59 = vsel %vm310_vm3, %v1915_v1, 0.0  ;;  %v1917_v25 = vmul.f32 %v3247_v34, %v3247_v34  ;;  %v422_v1 = vld [vmem:[#allocation2 + $0x178] sm:$0xff] }
 0x12f   : > { %v3266_v60 = vld [vmem:[#allocation2 + $0x38] sm:$0xff]  ;;  %1719 = vst.msk [vmem:[%s3207_s14 + $0x18] sm:$0xf] %vm1712_vm4, %v2486_v55  ;;  %v1788_v34 = vsel %vm310_vm3, %v3259_v49, 0.0 }
 0x130   : > { %v2487_v62 = vpack.c.bf16 %v3266_v60, %v3266_v60  ;;  %1334 = vst.msk [vmem:[#allocation2 + $0x48] sm:$0xff] %vm310_vm3, %v1269_v56  ;;  %v1431_v3 = vld [vmem:[#allocation2 + $0x138] sm:$0xff]  ;;  %1366 = vst.msk [vmem:[#allocation2 + $0x148] sm:$0xff] %vm310_vm3, %v1301_v0  ;;  %v420_v0 = vld [vmem:[#allocation2 + $0x168] sm:$0xff]  ;;  %v1982_v8 = vadd.f32 %v1981_v59, %v1980_v54 }
 0x131   : > { %1751 = vst.msk [vmem:[%s3207_s14 + $0x98] sm:$0xf] %vm1712_vm4, %v2518_v61  ;;  %v2519_v6 = vpack.c.bf16 %v1431_v3, %v1431_v3  ;;  %v1783_v3 = vadd.f32 %v1782_v46, %v1781_v40 }
 0x132   : > { %1720 = vst.msk [vmem:[%s3207_s14 + $0x1c] sm:$0xf] %vm1712_vm4, %v2487_v62  ;;  %v1045_v4 = vpop.f32.mrb[20].mxu0  ;;  %v1173_v7 = vpop.f32.mrb[20].mxu1 }
 0x133   : > { %v1270_v10 = vadd.f32 %v1045_v4, %v385_v63  ;;  %v1047_v11 = vpop.f32.mrb[21].mxu0  ;;  %v1302_v12 = vadd.f32 %v1173_v7, %v417_v2  ;;  %v1175_v13 = vpop.f32.mrb[21].mxu1  ;;  %1752 = vst.msk [vmem:[%s3207_s14 + $0x9c] sm:$0xf] %vm1712_vm4, %v2519_v6  ;;  %v1983_v6 = vsel %vm310_vm3, %v1916_v47, 0.0 }
 0x134   : > { %v3283_v15 = vld [vmem:[#allocation2 + $0x40] sm:$0xff]  ;;  %v1048_v16 = vpop.f32.mrb[22].mxu0  ;;  %v1176_v17 = vpop.f32.mrb[22].mxu1  ;;  %v389_v11 = vld [vmem:[#allocation2 + $0x70] sm:$0xff]  ;;  %v1984_v18 = vadd.f32 %v1983_v6, %v1982_v8 }
 0x135   : > { %v2488_v20 = vpack.c.bf16 %v3283_v15, %v3283_v15  ;;  %1335 = vst.msk [vmem:[#allocation2 + $0x50] sm:$0xff] %vm310_vm3, %v1270_v10  ;;  %v1271_v21 = vadd.f32 %v1048_v16, %v386_v5  ;;  %v1050_v22 = vpop.f32.mrb[23].mxu0  ;;  %v1432_v23 = vld [vmem:[#allocation2 + $0x140] sm:$0xff]  ;;  %1367 = vst.msk [vmem:[#allocation2 + $0x150] sm:$0xff] %vm310_vm3, %v1302_v12  ;;  %v1178_v26 = vpop.f32.mrb[23].mxu1  ;;  %v1303_v35 = vadd.f32 %v1176_v17, %v418_v24  ;;  %v421_v13 = vld [vmem:[#allocation2 + $0x170] sm:$0xff] }
 0x136   : > { %v2520_v50 = vpack.c.bf16 %v1432_v23, %v1432_v23  ;;  %v1785_v10 = vadd.f32 %v1784_v9, %v1783_v3  ;;  %v1918_v16 = vmul.f32 %v3259_v49, %v3259_v49  ;;  %v1985_v23 = vsel %vm310_vm3, %v1917_v25, 0.0 }
 0x137   : > { %v3295_v27 = vld [vmem:[#allocation2 + $0x48] sm:$0xff]  ;;  %1721 = vst.msk [vmem:[%s3207_s14 + $0x20] sm:$0xf] %vm1712_vm4, %v2488_v20  ;;  %v390_v20 = vld [vmem:[#allocation2 + $0x78] sm:$0xff]  ;;  %v1986_v39 = vadd.f32 %v1985_v23, %v1984_v18 }
 0x138   : > { %v2489_v31 = vpack.c.bf16 %v3295_v27, %v3295_v27  ;;  %1336 = vst.msk [vmem:[#allocation2 + $0x58] sm:$0xff] %vm310_vm3, %v1271_v21  ;;  %v1433_v38 = vld [vmem:[#allocation2 + $0x148] sm:$0xff]  ;;  %1368 = vst.msk [vmem:[#allocation2 + $0x158] sm:$0xff] %vm310_vm3, %v1303_v35  ;;  %v1787_v29 = vadd.f32 %v1786_v14, %v1785_v10  ;;  %v1987_v35 = vsel %vm310_vm3, %v1918_v16, 0.0  ;;  %v1794_v10 = vsel %vm310_vm3, %v3295_v27, 0.0 }
 0x139   : > { %1753 = vst.msk [vmem:[%s3207_s14 + $0xa0] sm:$0xf] %vm1712_vm4, %v2520_v50  ;;  %v2521_v44 = vpack.c.bf16 %v1433_v38, %v1433_v38  ;;  %v1988_v47 = vadd.f32 %v1987_v35, %v1986_v39  ;;  %v424_v16 = vld [vmem:[#allocation2 + $0x188] sm:$0xff] }
 0x13a   : > { %1722 = vst.msk [vmem:[%s3207_s14 + $0x24] sm:$0xf] %vm1712_vm4, %v2489_v31  ;;  %v1053_v41 = vpop.f32.mrb[24].mxu0  ;;  %v1181_v45 = vpop.f32.mrb[24].mxu1  ;;  %v1789_v40 = vadd.f32 %v1788_v34, %v1787_v29 }
 0x13b   : > { %v1272_v48 = vadd.f32 %v1053_v41, %v387_v33  ;;  %v1055_v51 = vpop.f32.mrb[25].mxu0  ;;  %v1304_v52 = vadd.f32 %v1181_v45, %v419_v36  ;;  %v1183_v53 = vpop.f32.mrb[25].mxu1  ;;  %1754 = vst.msk [vmem:[%s3207_s14 + $0xa4] sm:$0xf] %vm1712_vm4, %v2521_v44  ;;  %v1919_v36 = vmul.f32 %v3266_v60, %v3266_v60  ;;  %v1790_v44 = vsel %vm310_vm3, %v3266_v60, 0.0 }
 0x13c   : > { %v3320_v55 = vld [vmem:[#allocation2 + $0x50] sm:$0xff]  ;;  %v1056_v56 = vpop.f32.mrb[26].mxu0  ;;  %v1184_v58 = vpop.f32.mrb[26].mxu1  ;;  %v1920_v45 = vmul.f32 %v3283_v15, %v3283_v15  ;;  %v1792_v60 = vsel %vm310_vm3, %v3283_v15, 0.0 }
 0x13d   : > { %v1434_v57 = vld [vmem:[#allocation2 + $0x150] sm:$0xff]  ;;  %v2490_v61 = vpack.c.bf16 %v3320_v55, %v3320_v55  ;;  %1337 = vst.msk [vmem:[#allocation2 + $0x60] sm:$0xff] %vm310_vm3, %v1272_v48  ;;  %v1273_v62 = vadd.f32 %v1056_v56, %v388_v43  ;;  %v1058_v63 = vpop.f32.mrb[27].mxu0  ;;  %1369 = vst.msk [vmem:[#allocation2 + $0x160] sm:$0xff] %vm310_vm3, %v1304_v52  ;;  %v1186_v2 = vpop.f32.mrb[27].mxu1  ;;  %v1305_v12 = vadd.f32 %v1184_v58, %v420_v0  ;;  %v391_v48 = vld [vmem:[#allocation2 + $0x80] sm:$0xff] }
 0x13e   : > { %v2522_v5 = vpack.c.bf16 %v1434_v57, %v1434_v57  ;;  %v423_v52 = vld [vmem:[#allocation2 + $0x180] sm:$0xff]  ;;  %v1989_v53 = vsel %vm310_vm3, %v1919_v36, 0.0  ;;  %v1791_v56 = vadd.f32 %v1790_v44, %v1789_v40  ;;  %v392_v58 = vld [vmem:[#allocation2 + $0x88] sm:$0xff]  ;;  %v394_v36 = vld [vmem:[#allocation2 + $0x98] sm:$0xff] }
 0x13f   : > { %v3331_v4 = vld [vmem:[#allocation2 + $0x58] sm:$0xff]  ;;  %1723 = vst.msk [vmem:[%s3207_s14 + $0x28] sm:$0xf] %vm1712_vm4, %v2490_v61  ;;  %v1991_v61 = vsel %vm310_vm3, %v1920_v45, 0.0  ;;  %v1990_v3 = vadd.f32 %v1989_v53, %v1988_v47 }
 0x140   : > { %v2491_v7 = vpack.c.bf16 %v3331_v4, %v3331_v4  ;;  %1338 = vst.msk [vmem:[#allocation2 + $0x68] sm:$0xff] %vm310_vm3, %v1273_v62  ;;  %v3349_v17 = vld [vmem:[#allocation2 + $0x158] sm:$0xff]  ;;  %1370 = vst.msk [vmem:[#allocation2 + $0x168] sm:$0xff] %vm310_vm3, %v1305_v12  ;;  %v1921_v62 = vmul.f32 %v3295_v27, %v3295_v27  ;;  %v1923_v29 = vmul.f32 %v3331_v4, %v3331_v4 }
 0x141   : > { %1755 = vst.msk [vmem:[%s3207_s14 + $0xa8] sm:$0xf] %vm1712_vm4, %v2522_v5  ;;  %v2523_v21 = vpack.c.bf16 %v3349_v17, %v3349_v17  ;;  %v1793_v5 = vadd.f32 %v1792_v60, %v1791_v56  ;;  %v426_v56 = vld [vmem:[#allocation2 + $0x198] sm:$0xff] }
 0x142   : > { %1724 = vst.msk [vmem:[%s3207_s14 + $0x2c] sm:$0xf] %vm1712_vm4, %v2491_v7  ;;  %v1061_v19 = vpop.f32.mrb[28].mxu0  ;;  %v1189_v22 = vpop.f32.mrb[28].mxu1 }
 0x143   : > { %v1274_v24 = vadd.f32 %v1061_v19, %v389_v11  ;;  %v1063_v26 = vpop.f32.mrb[29].mxu0  ;;  %v1306_v50 = vadd.f32 %v1189_v22, %v421_v13  ;;  %v1191_v28 = vpop.f32.mrb[29].mxu1  ;;  %1756 = vst.msk [vmem:[%s3207_s14 + $0xac] sm:$0xf] %vm1712_vm4, %v2523_v21  ;;  %v1922_v11 = vmul.f32 %v3320_v55, %v3320_v55  ;;  %v1992_v19 = vadd.f32 %v1991_v61, %v1990_v3  ;;  %v427_v3 = vld [vmem:[#allocation2 + $0x1a0] sm:$0xff] }
 0x144   : > { %v3357_v30 = vld [vmem:[#allocation2 + $0x60] sm:$0xff]  ;;  %v1064_v31 = vpop.f32.mrb[30].mxu0  ;;  %v1192_v33 = vpop.f32.mrb[30].mxu1  ;;  %v1993_v21 = vsel %vm310_vm3, %v1921_v62, 0.0  ;;  %v1796_v22 = vsel %vm310_vm3, %v3320_v55, 0.0  ;;  %v1795_v34 = vadd.f32 %v1794_v10, %v1793_v5 }
 0x145   : > { %v3361_v32 = vld [vmem:[#allocation2 + $0x160] sm:$0xff]  ;;  %v2492_v49 = vpack.c.bf16 %v3357_v30, %v3357_v30  ;;  %1339 = vst.msk [vmem:[#allocation2 + $0x70] sm:$0xff] %vm310_vm3, %v1274_v24  ;;  %v1275_v42 = vadd.f32 %v1064_v31, %v390_v20  ;;  %v1066_v37 = vpop.f32.mrb[31].mxu0  ;;  %1371 = vst.msk [vmem:[#allocation2 + $0x170] sm:$0xff] %vm310_vm3, %v1306_v50  ;;  %v1194_v38 = vpop.f32.mrb[31].mxu1  ;;  %v1307_v51 = vadd.f32 %v1192_v33, %v422_v1  ;;  %v393_v24 = vld [vmem:[#allocation2 + $0x90] sm:$0xff] }
 0x146   : > { %v2524_v43 = vpack.c.bf16 %v3361_v32, %v3361_v32  ;;  %v425_v50 = vld [vmem:[#allocation2 + $0x190] sm:$0xff]  ;;  %v1995_v28 = vsel %vm310_vm3, %v1922_v11, 0.0  ;;  %v1994_v31 = vadd.f32 %v1993_v21, %v1992_v19  ;;  %v1797_v33 = vadd.f32 %v1796_v22, %v1795_v34 }
 0x147   : > { %v3370_v41 = vld [vmem:[#allocation2 + $0x68] sm:$0xff]  ;;  %1725 = vst.msk [vmem:[%s3207_s14 + $0x30] sm:$0xf] %vm1712_vm4, %v2492_v49  ;;  %v1798_v37 = vsel %vm310_vm3, %v3331_v4, 0.0  ;;  %v1924_v1 = vmul.f32 %v3357_v30, %v3357_v30  ;;  %v1800_v4 = vsel %vm310_vm3, %v3357_v30, 0.0 }
 0x148   : > { %v2493_v46 = vpack.c.bf16 %v3370_v41, %v3370_v41  ;;  %1340 = vst.msk [vmem:[#allocation2 + $0x78] sm:$0xff] %vm310_vm3, %v1275_v42  ;;  %v3390_v54 = vld [vmem:[#allocation2 + $0x168] sm:$0xff]  ;;  %1372 = vst.msk [vmem:[#allocation2 + $0x178] sm:$0xff] %vm310_vm3, %v1307_v51  ;;  %v1996_v44 = vadd.f32 %v1995_v28, %v1994_v31  ;;  %v1997_v51 = vsel %vm310_vm3, %v1923_v29, 0.0  ;;  %v1925_v61 = vmul.f32 %v3370_v41, %v3370_v41 }
 0x149   : > { %1757 = vst.msk [vmem:[%s3207_s14 + $0xb0] sm:$0xf] %vm1712_vm4, %v2524_v43  ;;  %v2525_v59 = vpack.c.bf16 %v3390_v54, %v3390_v54  ;;  %v1999_v30 = vsel %vm310_vm3, %v1924_v1, 0.0  ;;  %v1802_v5 = vsel %vm310_vm3, %v3370_v41, 0.0 }
 0x14a   : > { %1726 = vst.msk [vmem:[%s3207_s14 + $0x34] sm:$0xf] %vm1712_vm4, %v2493_v46  ;;  %v1069_v57 = vpop.f32.mrb[32].mxu0  ;;  %v1197_v9 = vpop.f32.mrb[32].mxu1 }
 0x14b   : > { %v1276_v15 = vadd.f32 %v1069_v57, %v391_v48  ;;  %v1071_v63 = vpop.f32.mrb[33].mxu0  ;;  %v1308_v0 = vadd.f32 %v1197_v9, %v423_v52  ;;  %v1199_v2 = vpop.f32.mrb[33].mxu1  ;;  %1758 = vst.msk [vmem:[%s3207_s14 + $0xb4] sm:$0xf] %vm1712_vm4, %v2525_v59 }
 0x14c   : > { %v3398_v6 = vld [vmem:[#allocation2 + $0x70] sm:$0xff]  ;;  %v1072_v25 = vpop.f32.mrb[34].mxu0  ;;  %v1200_v8 = vpop.f32.mrb[34].mxu1 }
 0x14d   : > { %v3402_v7 = vld [vmem:[#allocation2 + $0x170] sm:$0xff]  ;;  %v2494_v12 = vpack.c.bf16 %v3398_v6, %v3398_v6  ;;  %1341 = vst.msk [vmem:[#allocation2 + $0x80] sm:$0xff] %vm310_vm3, %v1276_v15  ;;  %v1277_v13 = vadd.f32 %v1072_v25, %v392_v58  ;;  %v1074_v14 = vpop.f32.mrb[35].mxu0  ;;  %1373 = vst.msk [vmem:[#allocation2 + $0x180] sm:$0xff] %vm310_vm3, %v1308_v0  ;;  %v1202_v18 = vpop.f32.mrb[35].mxu1  ;;  %v1309_v26 = vadd.f32 %v1200_v8, %v424_v16  ;;  %v395_v0 = vld [vmem:[#allocation2 + $0xa0] sm:$0xff] }
 0x14e   : > { %v2526_v27 = vpack.c.bf16 %v3402_v7, %v3402_v7  ;;  %v1799_v58 = vadd.f32 %v1798_v37, %v1797_v33  ;;  %v1998_v15 = vadd.f32 %v1997_v51, %v1996_v44  ;;  %v1926_v25 = vmul.f32 %v3398_v6, %v3398_v6  ;;  %v428_v33 = vld [vmem:[#allocation2 + $0x1a8] sm:$0xff] }
 0x14f   : > { %v3412_v20 = vld [vmem:[#allocation2 + $0x78] sm:$0xff]  ;;  %1727 = vst.msk [vmem:[%s3207_s14 + $0x38] sm:$0xf] %vm1712_vm4, %v2494_v12  ;;  %v396_v12 = vld [vmem:[#allocation2 + $0xa8] sm:$0xff]  ;;  %v2001_v16 = vsel %vm310_vm3, %v1925_v61, 0.0  ;;  %v1804_v41 = vsel %vm310_vm3, %v3398_v6, 0.0 }
 0x150   : > { %v2495_v23 = vpack.c.bf16 %v3412_v20, %v3412_v20  ;;  %1342 = vst.msk [vmem:[#allocation2 + $0x88] sm:$0xff] %vm310_vm3, %v1277_v13  ;;  %v3431_v55 = vld [vmem:[#allocation2 + $0x178] sm:$0xff]  ;;  %1374 = vst.msk [vmem:[#allocation2 + $0x188] sm:$0xff] %vm310_vm3, %v1309_v26  ;;  %v1801_v63 = vadd.f32 %v1800_v4, %v1799_v58  ;;  %v2000_v10 = vadd.f32 %v1999_v30, %v1998_v15  ;;  %v1806_v1 = vsel %vm310_vm3, %v3412_v20, 0.0 }
 0x151   : > { %1759 = vst.msk [vmem:[%s3207_s14 + $0xb8] sm:$0xf] %vm1712_vm4, %v2526_v27  ;;  %v2527_v49 = vpack.c.bf16 %v3431_v55, %v3431_v55  ;;  %v1927_v28 = vmul.f32 %v3412_v20, %v3412_v20 }
 0x152   : > { %1728 = vst.msk [vmem:[%s3207_s14 + $0x3c] sm:$0xf] %vm1712_vm4, %v2495_v23  ;;  %v1077_v35 = vpop.f32.mrb[36].mxu0  ;;  %v1205_v42 = vpop.f32.mrb[36].mxu1  ;;  %v1803_v22 = vadd.f32 %v1802_v5, %v1801_v63 }
 0x153   : > { %v1278_v38 = vadd.f32 %v1077_v35, %v393_v24  ;;  %v1079_v39 = vpop.f32.mrb[37].mxu0  ;;  %v1310_v40 = vadd.f32 %v1205_v42, %v425_v50  ;;  %v1207_v43 = vpop.f32.mrb[37].mxu1  ;;  %1760 = vst.msk [vmem:[%s3207_s14 + $0xbc] sm:$0xf] %vm1712_vm4, %v2527_v49  ;;  %v2003_v50 = vsel %vm310_vm3, %v1926_v25, 0.0 }
 0x154   : > { %v3440_v45 = vld [vmem:[#allocation2 + $0x80] sm:$0xff]  ;;  %v1080_v46 = vpop.f32.mrb[38].mxu0  ;;  %v1208_v48 = vpop.f32.mrb[38].mxu1  ;;  %v1805_v49 = vadd.f32 %v1804_v41, %v1803_v22  ;;  %v397_v43 = vld [vmem:[#allocation2 + $0xb0] sm:$0xff] }
 0x155   : > { %v3444_v47 = vld [vmem:[#allocation2 + $0x180] sm:$0xff]  ;;  %v2496_v52 = vpack.c.bf16 %v3440_v45, %v3440_v45  ;;  %1343 = vst.msk [vmem:[#allocation2 + $0x90] sm:$0xff] %vm310_vm3, %v1278_v38  ;;  %v1279_v53 = vadd.f32 %v1080_v46, %v394_v36  ;;  %v1082_v60 = vpop.f32.mrb[39].mxu0  ;;  %1375 = vst.msk [vmem:[#allocation2 + $0x190] sm:$0xff] %vm310_vm3, %v1310_v40  ;;  %v1210_v57 = vpop.f32.mrb[39].mxu1  ;;  %v1311_v2 = vadd.f32 %v1208_v48, %v426_v56  ;;  %v429_v46 = vld [vmem:[#allocation2 + $0x1b0] sm:$0xff] }
 0x156   : > { %v2528_v9 = vpack.c.bf16 %v3444_v47, %v3444_v47  ;;  %v2002_v36 = vadd.f32 %v2001_v16, %v2000_v10  ;;  %v1928_v38 = vmul.f32 %v3440_v45, %v3440_v45  ;;  %v2005_v48 = vsel %vm310_vm3, %v1927_v28, 0.0  ;;  %v399_v22 = vld [vmem:[#allocation2 + $0xc0] sm:$0xff] }
 0x157   : > { %v3453_v59 = vld [vmem:[#allocation2 + $0x88] sm:$0xff]  ;;  %1729 = vst.msk [vmem:[%s3207_s14 + $0x40] sm:$0xf] %vm1712_vm4, %v2496_v52  ;;  %v1808_v20 = vsel %vm310_vm3, %v3440_v45, 0.0  ;;  %v1807_v4 = vadd.f32 %v1806_v1, %v1805_v49 }
 0x158   : > { %v2497_v62 = vpack.c.bf16 %v3453_v59, %v3453_v59  ;;  %1344 = vst.msk [vmem:[#allocation2 + $0x98] sm:$0xff] %vm310_vm3, %v1279_v53  ;;  %v3473_v8 = vld [vmem:[#allocation2 + $0x188] sm:$0xff]  ;;  %1376 = vst.msk [vmem:[#allocation2 + $0x198] sm:$0xff] %vm310_vm3, %v1311_v2  ;;  %v2004_v40 = vadd.f32 %v2003_v50, %v2002_v36  ;;  %v398_v53 = vld [vmem:[#allocation2 + $0xb8] sm:$0xff]  ;;  %v2007_v57 = vsel %vm310_vm3, %v1928_v38, 0.0  ;;  %v1929_v58 = vmul.f32 %v3453_v59, %v3453_v59 }
 0x159   : > { %1761 = vst.msk [vmem:[%s3207_s14 + $0xc0] sm:$0xf] %vm1712_vm4, %v2528_v9  ;;  %v2529_v13 = vpack.c.bf16 %v3473_v8, %v3473_v8  ;;  %v1809_v15 = vadd.f32 %v1808_v20, %v1807_v4  ;;  %v1810_v5 = vsel %vm310_vm3, %v3453_v59, 0.0 }
 0x15a   : > { %1730 = vst.msk [vmem:[%s3207_s14 + $0x44] sm:$0xf] %vm1712_vm4, %v2497_v62  ;;  %v1085_v11 = vpop.f32.mrb[40].mxu0  ;;  %v1213_v14 = vpop.f32.mrb[40].mxu1  ;;  %v2006_v62 = vadd.f32 %v2005_v48, %v2004_v40  ;;  %v2009_v59 = vsel %vm310_vm3, %v1929_v58, 0.0 }
 0x15b   : > { %v1280_v18 = vadd.f32 %v1085_v11, %v395_v0  ;;  %v1087_v19 = vpop.f32.mrb[41].mxu0  ;;  %v1312_v27 = vadd.f32 %v1213_v14, %v427_v3  ;;  %v1215_v21 = vpop.f32.mrb[41].mxu1  ;;  %1762 = vst.msk [vmem:[%s3207_s14 + $0xc4] sm:$0xf] %vm1712_vm4, %v2529_v13  ;;  %v430_v13 = vld [vmem:[#allocation2 + $0x1b8] sm:$0xff] }
 0x15c   : > { %v3481_v23 = vld [vmem:[#allocation2 + $0x90] sm:$0xff]  ;;  %v1088_v34 = vpop.f32.mrb[42].mxu0  ;;  %v1216_v26 = vpop.f32.mrb[42].mxu1  ;;  %v2008_v16 = vadd.f32 %v2007_v57, %v2006_v62  ;;  %v1811_v21 = vadd.f32 %v1810_v5, %v1809_v15 }
 0x15d   : > { %v3485_v24 = vld [vmem:[#allocation2 + $0x190] sm:$0xff]  ;;  %v2498_v6 = vpack.c.bf16 %v3481_v23, %v3481_v23  ;;  %1345 = vst.msk [vmem:[#allocation2 + $0xa0] sm:$0xff] %vm310_vm3, %v1280_v18  ;;  %v1281_v29 = vadd.f32 %v1088_v34, %v396_v12  ;;  %v1090_v31 = vpop.f32.mrb[43].mxu0  ;;  %1377 = vst.msk [vmem:[#allocation2 + $0x1a0] sm:$0xff] %vm310_vm3, %v1312_v27  ;;  %v1218_v35 = vpop.f32.mrb[43].mxu1  ;;  %v1313_v44 = vadd.f32 %v1216_v26, %v428_v33  ;;  %v1812_v19 = vsel %vm310_vm3, %v3481_v23, 0.0 }
 0x15e   : > { %v2530_v37 = vpack.c.bf16 %v3485_v24, %v3485_v24  ;;  %v1930_v25 = vmul.f32 %v3481_v23, %v3481_v23  ;;  %v431_v26 = vld [vmem:[#allocation2 + $0x1c0] sm:$0xff]  ;;  %v2010_v23 = vadd.f32 %v2009_v59, %v2008_v16  ;;  %v400_v33 = vld [vmem:[#allocation2 + $0xc8] sm:$0xff]  ;;  %v433_v5 = vld [vmem:[#allocation2 + $0x1d0] sm:$0xff] }
 0x15f   : > { %v3494_v42 = vld [vmem:[#allocation2 + $0x98] sm:$0xff]  ;;  %1731 = vst.msk [vmem:[%s3207_s14 + $0x48] sm:$0xf] %vm1712_vm4, %v2498_v6 }
 0x160   : > { %v2499_v39 = vpack.c.bf16 %v3494_v42, %v3494_v42  ;;  %1346 = vst.msk [vmem:[#allocation2 + $0xa8] sm:$0xff] %vm310_vm3, %v1281_v29  ;;  %v3514_v51 = vld [vmem:[#allocation2 + $0x198] sm:$0xff]  ;;  %1378 = vst.msk [vmem:[#allocation2 + $0x1a8] sm:$0xff] %vm310_vm3, %v1313_v44  ;;  %v2011_v50 = vsel %vm310_vm3, %v1930_v25, 0.0  ;;  %v1931_v28 = vmul.f32 %v3494_v42, %v3494_v42  ;;  %v1813_v29 = vadd.f32 %v1812_v19, %v1811_v21 }
 0x161   : > { %1763 = vst.msk [vmem:[%s3207_s14 + $0xc8] sm:$0xf] %vm1712_vm4, %v2530_v37  ;;  %v2531_v60 = vpack.c.bf16 %v3514_v51, %v3514_v51  ;;  %v1814_v49 = vsel %vm310_vm3, %v3494_v42, 0.0 }
 0x162   : > { %1732 = vst.msk [vmem:[%s3207_s14 + $0x4c] sm:$0xf] %vm1712_vm4, %v2499_v39  ;;  %v1093_v52 = vpop.f32.mrb[44].mxu0  ;;  %v1221_v56 = vpop.f32.mrb[44].mxu1  ;;  %v2013_v4 = vsel %vm310_vm3, %v1931_v28, 0.0  ;;  %v1815_v58 = vadd.f32 %v1814_v49, %v1813_v29  ;;  %v434_v49 = vld [vmem:[#allocation2 + $0x1d8] sm:$0xff] }
 0x163   : > { %v1282_v45 = vadd.f32 %v1093_v52, %v397_v43  ;;  %v1095_v9 = vpop.f32.mrb[45].mxu0  ;;  %v1314_v30 = vadd.f32 %v1221_v56, %v429_v46  ;;  %v1223_v61 = vpop.f32.mrb[45].mxu1  ;;  %1764 = vst.msk [vmem:[%s3207_s14 + $0xcc] sm:$0xf] %vm1712_vm4, %v2531_v60  ;;  %v2012_v43 = vadd.f32 %v2011_v50, %v2010_v23  ;;  %v432_v56 = vld [vmem:[#allocation2 + $0x1c8] sm:$0xff] }
 0x164   : > { %v1412_v63 = vld [vmem:[#allocation2 + $0xa0] sm:$0xff]  ;;  %v1096_v0 = vpop.f32.mrb[46].mxu0  ;;  %v1224_v3 = vpop.f32.mrb[46].mxu1 }
 0x165   : > { %v3524_v2 = vld [vmem:[#allocation2 + $0x1a0] sm:$0xff]  ;;  %v2500_v10 = vpack.c.bf16 %v1412_v63, %v1412_v63  ;;  %1347 = vst.msk [vmem:[#allocation2 + $0xb0] sm:$0xff] %vm310_vm3, %v1282_v45  ;;  %v1283_v11 = vadd.f32 %v1096_v0, %v398_v53  ;;  %v1098_v12 = vpop.f32.mrb[47].mxu0  ;;  %1379 = vst.msk [vmem:[#allocation2 + $0x1b0] sm:$0xff] %vm310_vm3, %v1314_v30  ;;  %v1226_v14 = vpop.f32.mrb[47].mxu1  ;;  %v1315_v34 = vadd.f32 %v1224_v3, %v430_v13  ;;  %v1816_v52 = vsel %vm310_vm3, %v1412_v63, 0.0 }
 0x166   : > { %v2532_v18 = vpack.c.bf16 %v3524_v2, %v3524_v2  ;;  %v1932_v37 = vmul.f32 %v1412_v63, %v1412_v63  ;;  %v2014_v15 = vadd.f32 %v2013_v4, %v2012_v43  ;;  %v1817_v63 = vadd.f32 %v1816_v52, %v1815_v58  ;;  %v401_v0 = vld [vmem:[#allocation2 + $0xd0] sm:$0xff]  ;;  %v402_v14 = vld [vmem:[#allocation2 + $0xd8] sm:$0xff]  ;;  %v403_v4 = vld [vmem:[#allocation2 + $0xe0] sm:$0xff] }
 0x167   : > { %v1413_v41 = vld [vmem:[#allocation2 + $0xa8] sm:$0xff]  ;;  %1733 = vst.msk [vmem:[%s3207_s14 + $0x50] sm:$0xf] %vm1712_vm4, %v2500_v10 }
 0x168   : > { %v2501_v27 = vpack.c.bf16 %v1413_v41, %v1413_v41  ;;  %1348 = vst.msk [vmem:[#allocation2 + $0xb8] sm:$0xff] %vm310_vm3, %v1283_v11  ;;  %v3547_v6 = vld [vmem:[#allocation2 + $0x1a8] sm:$0xff]  ;;  %1380 = vst.msk [vmem:[#allocation2 + $0x1b8] sm:$0xff] %vm310_vm3, %v1315_v34  ;;  %v2015_v30 = vsel %vm310_vm3, %v1932_v37, 0.0  ;;  %v1933_v61 = vmul.f32 %v1413_v41, %v1413_v41  ;;  %v1818_v25 = vsel %vm310_vm3, %v1413_v41, 0.0 }
 0x169   : > { %1765 = vst.msk [vmem:[%s3207_s14 + $0xd0] sm:$0xf] %vm1712_vm4, %v2532_v18  ;;  %v2533_v35 = vpack.c.bf16 %v3547_v6, %v3547_v6  ;;  %v2016_v12 = vadd.f32 %v2015_v30, %v2014_v15  ;;  %v1819_v34 = vadd.f32 %v1818_v25, %v1817_v63 }
 0x16a   : > { %1734 = vst.msk [vmem:[%s3207_s14 + $0x54] sm:$0xf] %vm1712_vm4, %v2501_v27  ;;  %v1101_v31 = vpop.f32.mrb[48].mxu0  ;;  %v1229_v36 = vpop.f32.mrb[48].mxu1  ;;  %v2017_v59 = vsel %vm310_vm3, %v1933_v61, 0.0 }
 0x16b   : > { %v1284_v1 = vadd.f32 %v1101_v31, %v399_v22  ;;  %v1103_v38 = vpop.f32.mrb[49].mxu0  ;;  %v1316_v39 = vadd.f32 %v1229_v36, %v431_v26  ;;  %v1231_v40 = vpop.f32.mrb[49].mxu1  ;;  %1766 = vst.msk [vmem:[%s3207_s14 + $0xd4] sm:$0xf] %vm1712_vm4, %v2533_v35 }
 0x16c   : > { %v1414_v44 = vld [vmem:[#allocation2 + $0xb0] sm:$0xff]  ;;  %v1104_v46 = vpop.f32.mrb[50].mxu0  ;;  %v1232_v20 = vpop.f32.mrb[50].mxu1 }
 0x16d   : > { %v3556_v48 = vld [vmem:[#allocation2 + $0x1b0] sm:$0xff]  ;;  %v2502_v53 = vpack.c.bf16 %v1414_v44, %v1414_v44  ;;  %1349 = vst.msk [vmem:[#allocation2 + $0xc0] sm:$0xff] %vm310_vm3, %v1284_v1  ;;  %v1285_v42 = vadd.f32 %v1104_v46, %v400_v33  ;;  %v1106_v60 = vpop.f32.mrb[51].mxu0  ;;  %1381 = vst.msk [vmem:[#allocation2 + $0x1c0] sm:$0xff] %vm310_vm3, %v1316_v39  ;;  %v1234_v57 = vpop.f32.mrb[51].mxu1  ;;  %v1317_v3 = vadd.f32 %v1232_v20, %v432_v56  ;;  %v1820_v19 = vsel %vm310_vm3, %v1414_v44, 0.0 }
 0x16e   : > { %v2534_v9 = vpack.c.bf16 %v3556_v48, %v3556_v48  ;;  %v1934_v10 = vmul.f32 %v1414_v44, %v1414_v44  ;;  %v2018_v1 = vadd.f32 %v2017_v59, %v2016_v12  ;;  %v1821_v38 = vadd.f32 %v1820_v19, %v1819_v34 }
 0x16f   : > { %v1415_v45 = vld [vmem:[#allocation2 + $0xb8] sm:$0xff]  ;;  %1735 = vst.msk [vmem:[%s3207_s14 + $0x58] sm:$0xf] %vm1712_vm4, %v2502_v53  ;;  %v435_v53 = vld [vmem:[#allocation2 + $0x1e0] sm:$0xff] }
 0x170   : > { %v2503_v62 = vpack.c.bf16 %v1415_v45, %v1415_v45  ;;  %1350 = vst.msk [vmem:[#allocation2 + $0xc8] sm:$0xff] %vm310_vm3, %v1285_v42  ;;  %v3573_v11 = vld [vmem:[#allocation2 + $0x1b8] sm:$0xff]  ;;  %1382 = vst.msk [vmem:[#allocation2 + $0x1c8] sm:$0xff] %vm310_vm3, %v1317_v3  ;;  %v2019_v29 = vsel %vm310_vm3, %v1934_v10, 0.0  ;;  %v1935_v31 = vmul.f32 %v1415_v45, %v1415_v45  ;;  %v1822_v43 = vsel %vm310_vm3, %v1415_v45, 0.0  ;;  %v404_v45 = vld [vmem:[#allocation2 + $0xe8] sm:$0xff] }
 0x171   : > { %1767 = vst.msk [vmem:[%s3207_s14 + $0xd8] sm:$0xf] %vm1712_vm4, %v2534_v9  ;;  %v2535_v16 = vpack.c.bf16 %v3573_v11, %v3573_v11  ;;  %v2020_v20 = vadd.f32 %v2019_v29, %v2018_v1  ;;  %v1823_v57 = vadd.f32 %v1822_v43, %v1821_v38  ;;  %v406_v43 = vld [vmem:[#allocation2 + $0xf8] sm:$0xff] }
 0x172   : > { %1736 = vst.msk [vmem:[%s3207_s14 + $0x5c] sm:$0xf] %vm1712_vm4, %v2503_v62  ;;  %v1109_v13 = vpop.f32.mrb[52].mxu0  ;;  %v1237_v18 = vpop.f32.mrb[52].mxu1  ;;  %v2021_v42 = vsel %vm310_vm3, %v1935_v31, 0.0 }
 0x173   : > { %v1286_v41 = vadd.f32 %v1109_v13, %v401_v0  ;;  %v1111_v27 = vpop.f32.mrb[53].mxu0  ;;  %v1318_v21 = vadd.f32 %v1237_v18, %v433_v5  ;;  %v1239_v22 = vpop.f32.mrb[53].mxu1  ;;  %1768 = vst.msk [vmem:[%s3207_s14 + $0xdc] sm:$0xf] %vm1712_vm4, %v2535_v16  ;;  %v2022_v5 = vadd.f32 %v2021_v42, %v2020_v20 }
 0x174   : > { %v1416_v26 = vld [vmem:[#allocation2 + $0xc0] sm:$0xff]  ;;  %v1112_v50 = vpop.f32.mrb[54].mxu0  ;;  %v1240_v23 = vpop.f32.mrb[54].mxu1  ;;  %v436_v27 = vld [vmem:[#allocation2 + $0x1e8] sm:$0xff] }
 0x175   : > { %v3582_v28 = vld [vmem:[#allocation2 + $0x1c0] sm:$0xff]  ;;  %v2504_v33 = vpack.c.bf16 %v1416_v26, %v1416_v26  ;;  %1351 = vst.msk [vmem:[#allocation2 + $0xd0] sm:$0xff] %vm310_vm3, %v1286_v41  ;;  %v1287_v35 = vadd.f32 %v1112_v50, %v402_v14  ;;  %v1114_v36 = vpop.f32.mrb[55].mxu0  ;;  %1383 = vst.msk [vmem:[#allocation2 + $0x1d0] sm:$0xff] %vm310_vm3, %v1318_v21  ;;  %v1242_v37 = vpop.f32.mrb[55].mxu1  ;;  %v1936_v44 = vmul.f32 %v1416_v26, %v1416_v26  ;;  %v1824_v60 = vsel %vm310_vm3, %v1416_v26, 0.0 }
 0x176   : > { %v2536_v40 = vpack.c.bf16 %v3582_v28, %v3582_v28  ;;  %v1319_v52 = vadd.f32 %v1240_v23, %v434_v49  ;;  %v1825_v25 = vadd.f32 %v1824_v60, %v1823_v57  ;;  %v437_v49 = vld [vmem:[#allocation2 + $0x1f0] sm:$0xff] }
 0x177   : > { %v1417_v39 = vld [vmem:[#allocation2 + $0xc8] sm:$0xff]  ;;  %1737 = vst.msk [vmem:[%s3207_s14 + $0x60] sm:$0xf] %vm1712_vm4, %v2504_v33  ;;  %v2023_v61 = vsel %vm310_vm3, %v1936_v44, 0.0 }
 0x178   : > { %v2505_v46 = vpack.c.bf16 %v1417_v39, %v1417_v39  ;;  %1352 = vst.msk [vmem:[#allocation2 + $0xd8] sm:$0xff] %vm310_vm3, %v1287_v35  ;;  %v3599_v56 = vld [vmem:[#allocation2 + $0x1c8] sm:$0xff]  ;;  %1384 = vst.msk [vmem:[#allocation2 + $0x1d8] sm:$0xff] %vm310_vm3, %v1319_v52  ;;  %v1937_v62 = vmul.f32 %v1417_v39, %v1417_v39  ;;  %v1826_v16 = vsel %vm310_vm3, %v1417_v39, 0.0  ;;  %v2024_v22 = vadd.f32 %v2023_v61, %v2022_v5  ;;  %v405_v35 = vld [vmem:[#allocation2 + $0xf0] sm:$0xff] }
 0x179   : > { %1769 = vst.msk [vmem:[%s3207_s14 + $0xe0] sm:$0xf] %vm1712_vm4, %v2536_v40  ;;  %v2537_v9 = vpack.c.bf16 %v3599_v56, %v3599_v56  ;;  %v1827_v31 = vadd.f32 %v1826_v16, %v1825_v25 }
 0x17a   : > { %1738 = vst.msk [vmem:[%s3207_s14 + $0x64] sm:$0xf] %vm1712_vm4, %v2505_v46  ;;  %v1117_v58 = vpop.f32.mrb[56].mxu0  ;;  %v1245_v30 = vpop.f32.mrb[56].mxu1  ;;  %v2025_v50 = vsel %vm310_vm3, %v1937_v62, 0.0 }
 0x17b   : > { %v1288_v15 = vadd.f32 %v1117_v58, %v403_v4  ;;  %v1119_v63 = vpop.f32.mrb[57].mxu0  ;;  %v1320_v0 = vadd.f32 %v1245_v30, %v435_v53  ;;  %v1247_v3 = vpop.f32.mrb[57].mxu1  ;;  %1770 = vst.msk [vmem:[%s3207_s14 + $0xe4] sm:$0xf] %vm1712_vm4, %v2537_v9  ;;  %v2026_v38 = vadd.f32 %v2025_v50, %v2024_v22 }
 0x17c   : > { %v1418_v10 = vld [vmem:[#allocation2 + $0xd0] sm:$0xff]  ;;  %v1120_v12 = vpop.f32.mrb[58].mxu0  ;;  %v1248_v14 = vpop.f32.mrb[58].mxu1  ;;  %v438_v3 = vld [vmem:[#allocation2 + $0x1f8] sm:$0xff] }
 0x17d   : > { %v3607_v13 = vld [vmem:[#allocation2 + $0x1d0] sm:$0xff]  ;;  %v2506_v18 = vpack.c.bf16 %v1418_v10, %v1418_v10  ;;  %v1938_v59 = vmul.f32 %v1418_v10, %v1418_v10  ;;  %1353 = vst.msk [vmem:[#allocation2 + $0xe0] sm:$0xff] %vm310_vm3, %v1288_v15  ;;  %v1289_v19 = vadd.f32 %v1120_v12, %v404_v45  ;;  %v1122_v41 = vpop.f32.mrb[59].mxu0  ;;  %1385 = vst.msk [vmem:[#allocation2 + $0x1e0] sm:$0xff] %vm310_vm3, %v1320_v0  ;;  %v1250_v21 = vpop.f32.mrb[59].mxu1  ;;  %v1828_v23 = vsel %vm310_vm3, %v1418_v10, 0.0 }
 0x17e   : > { %v2538_v26 = vpack.c.bf16 %v3607_v13, %v3607_v13  ;;  %v1321_v36 = vadd.f32 %v1248_v14, %v436_v27  ;;  %v1829_v39 = vadd.f32 %v1828_v23, %v1827_v31 }
 0x17f   : > { %v1419_v34 = vld [vmem:[#allocation2 + $0xd8] sm:$0xff]  ;;  %1739 = vst.msk [vmem:[%s3207_s14 + $0x68] sm:$0xf] %vm1712_vm4, %v2506_v18  ;;  %v2027_v37 = vsel %vm310_vm3, %v1938_v59, 0.0 }
 0x180   : > { %v2507_v29 = vpack.c.bf16 %v1419_v34, %v1419_v34  ;;  %1354 = vst.msk [vmem:[#allocation2 + $0xe8] sm:$0xff] %vm310_vm3, %v1289_v19  ;;  %v1939_v33 = vmul.f32 %v1419_v34, %v1419_v34  ;;  %v3624_v1 = vld [vmem:[#allocation2 + $0x1d8] sm:$0xff]  ;;  %1386 = vst.msk [vmem:[#allocation2 + $0x1e8] sm:$0xff] %vm310_vm3, %v1321_v36  ;;  %v1830_v20 = vsel %vm310_vm3, %v1419_v34, 0.0  ;;  %v2028_v60 = vadd.f32 %v2027_v37, %v2026_v38  ;;  %v2731_v36 = vld [vmem:[#allocation2 + $0x100] sm:$0xff] }
 0x181   : > { %1771 = vst.msk [vmem:[%s3207_s14 + $0xe8] sm:$0xf] %vm1712_vm4, %v2538_v26  ;;  %v2539_v44 = vpack.c.bf16 %v3624_v1, %v3624_v1  ;;  %v1831_v25 = vadd.f32 %v1830_v20, %v1829_v39 }
 0x182   : > { %1740 = vst.msk [vmem:[%s3207_s14 + $0x6c] sm:$0xf] %vm1712_vm4, %v2507_v29  ;;  %v1125_v40 = vpop.f32.mrb[60].mxu0  ;;  %v1253_v46 = vpop.f32.mrb[60].mxu1  ;;  %v2029_v57 = vsel %vm310_vm3, %v1939_v33, 0.0 }
 0x183   : > { %v1290_v4 = vadd.f32 %v1125_v40, %v405_v35  ;;  %v1127_v52 = vpop.f32.mrb[61].mxu0  ;;  %v1322_v53 = vadd.f32 %v1253_v46, %v437_v49  ;;  %v1255_v42 = vpop.f32.mrb[61].mxu1  ;;  %1772 = vst.msk [vmem:[%s3207_s14 + $0xec] sm:$0xf] %vm1712_vm4, %v2539_v44  ;;  %v2030_v59 = vadd.f32 %v2029_v57, %v2028_v60  ;;  %v1944_v49 = vmul.f32 %v2731_v36, %v2731_v36 }
 0x184   : > { %v1420_v58 = vld [vmem:[#allocation2 + $0xe0] sm:$0xff]  ;;  %v1128_v45 = vpop.f32.mrb[62].mxu0  ;;  %v1256_v30 = vpop.f32.mrb[62].mxu1  ;;  %v2732_v42 = vld [vmem:[#allocation2 + $0x108] sm:$0xff] }
 0x185   : > { %v3633_v9 = vld [vmem:[#allocation2 + $0x1e0] sm:$0xff]  ;;  %v2508_v61 = vpack.c.bf16 %v1420_v58, %v1420_v58  ;;  %v1832_v62 = vsel %vm310_vm3, %v1420_v58, 0.0  ;;  %v1940_v15 = vmul.f32 %v1420_v58, %v1420_v58  ;;  %1355 = vst.msk [vmem:[#allocation2 + $0xf0] sm:$0xff] %vm310_vm3, %v1290_v4  ;;  %v1291_v63 = vadd.f32 %v1128_v45, %v406_v43  ;;  %v1130_v0 = vpop.f32.mrb[63].mxu0  ;;  %1387 = vst.msk [vmem:[#allocation2 + $0x1f0] sm:$0xff] %vm310_vm3, %v1322_v53  ;;  %v1258_v5 = vpop.f32.mrb[63].mxu1 }
 0x186   : > { %v2540_v12 = vpack.c.bf16 %v3633_v9, %v3633_v9  ;;  %v1833_v19 = vadd.f32 %v1832_v62, %v1831_v25  ;;  %v1323_v41 = vadd.f32 %v1256_v30, %v438_v3  ;;  %v1840_v53 = vsel %vm310_vm3, %v2731_v36, 0.0 }
 0x187   : > { %v1421_v10 = vld [vmem:[#allocation2 + $0xe8] sm:$0xff]  ;;  %1741 = vst.msk [vmem:[%s3207_s14 + $0x70] sm:$0xf] %vm1712_vm4, %v2508_v61  ;;  %v2031_v14 = vsel %vm310_vm3, %v1940_v15, 0.0  ;;  %v1945_v60 = vmul.f32 %v2732_v42, %v2732_v42  ;;  %v2039_v62 = vsel %vm310_vm3, %v1944_v49, 0.0  ;;  %v1842_v15 = vsel %vm310_vm3, %v2732_v42, 0.0 }
 0x188   : > { %v2509_v16 = vpack.c.bf16 %v1421_v10, %v1421_v10  ;;  %v1941_v18 = vmul.f32 %v1421_v10, %v1421_v10  ;;  %1356 = vst.msk [vmem:[#allocation2 + $0xf8] sm:$0xff] %vm310_vm3, %v1291_v63  ;;  %v1834_v27 = vsel %vm310_vm3, %v1421_v10, 0.0  ;;  %v3649_v21 = vld [vmem:[#allocation2 + $0x1e8] sm:$0xff]  ;;  %v2032_v22 = vadd.f32 %v2031_v14, %v2030_v59  ;;  %1388 = vst.msk [vmem:[#allocation2 + $0x1f8] sm:$0xff] %vm310_vm3, %v1323_v41  ;;  %v2733_v63 = vld [vmem:[#allocation2 + $0x110] sm:$0xff] }
 0x189   : > { %1773 = vst.msk [vmem:[%s3207_s14 + $0xf0] sm:$0xf] %vm1712_vm4, %v2540_v12  ;;  %v2541_v34 = vpack.c.bf16 %v3649_v21, %v3649_v21  ;;  %v1835_v50 = vadd.f32 %v1834_v27, %v1833_v19  ;;  %v1946_v0 = vmul.f32 %v2733_v63, %v2733_v63  ;;  %v2041_v25 = vsel %vm310_vm3, %v1945_v60, 0.0  ;;  %v2734_v12 = vld [vmem:[#allocation2 + $0x118] sm:$0xff] }
 0x18a   : > { %1742 = vst.msk [vmem:[%s3207_s14 + $0x74] sm:$0xf] %vm1712_vm4, %v2509_v16  ;;  %v2033_v26 = vsel %vm310_vm3, %v1941_v18, 0.0  ;;  %v1844_v10 = vsel %vm310_vm3, %v2733_v63, 0.0  ;;  %v1947_v14 = vmul.f32 %v2734_v12, %v2734_v12 }
 0x18b   : > { %1774 = vst.msk [vmem:[%s3207_s14 + $0xf4] sm:$0xf] %vm1712_vm4, %v2541_v34  ;;  %v2034_v37 = vadd.f32 %v2033_v26, %v2032_v22 }
 0x18c   : > { %v1422_v23 = vld [vmem:[#allocation2 + $0xf0] sm:$0xff] }
 0x18d   : > { %v3657_v29 = vld [vmem:[#allocation2 + $0x1f0] sm:$0xff]  ;;  %v2510_v31 = vpack.c.bf16 %v1422_v23, %v1422_v23  ;;  %v1836_v33 = vsel %vm310_vm3, %v1422_v23, 0.0  ;;  %v1942_v35 = vmul.f32 %v1422_v23, %v1422_v23 }
 0x18e   : > { %v1837_v38 = vadd.f32 %v1836_v33, %v1835_v50  ;;  %v2542_v40 = vpack.c.bf16 %v3657_v29, %v3657_v29 }
 0x18f   : > { %v1423_v39 = vld [vmem:[#allocation2 + $0xf8] sm:$0xff]  ;;  %1743 = vst.msk [vmem:[%s3207_s14 + $0x78] sm:$0xf] %vm1712_vm4, %v2510_v31  ;;  %v2035_v43 = vsel %vm310_vm3, %v1942_v35, 0.0 }
 0x190   : > { %v2511_v44 = vpack.c.bf16 %v1423_v39, %v1423_v39  ;;  %v1838_v46 = vsel %vm310_vm3, %v1423_v39, 0.0  ;;  %v1943_v20 = vmul.f32 %v1423_v39, %v1423_v39  ;;  %v2036_v4 = vadd.f32 %v2035_v43, %v2034_v37  ;;  %1775 = vst.msk [vmem:[%s3207_s14 + $0xf8] sm:$0xf] %vm1712_vm4, %v2542_v40  ;;  %v3674_v58 = vld [vmem:[#allocation2 + $0x1f8] sm:$0xff] }
 0x191   : > { %v1839_v52 = vadd.f32 %v1838_v46, %v1837_v38  ;;  %v2543_v61 = vpack.c.bf16 %v3674_v58, %v3674_v58 }
 0x192   : > { %1744 = vst.msk [vmem:[%s3207_s14 + $0x7c] sm:$0xf] %vm1712_vm4, %v2511_v44  ;;  %v2037_v57 = vsel %vm310_vm3, %v1943_v20, 0.0 }
 0x193   : > { %v1841_v45 = vadd.f32 %v1840_v53, %v1839_v52  ;;  %v2038_v30 = vadd.f32 %v2037_v57, %v2036_v4  ;;  %1776 = vst.msk [vmem:[%s3207_s14 + $0xfc] sm:$0xf] %vm1712_vm4, %v2543_v61 }
 0x195   : > { %v1843_v3 = vadd.f32 %v1842_v15, %v1841_v45  ;;  %v2040_v5 = vadd.f32 %v2039_v62, %v2038_v30 }
 0x196   : > { %2755 = shalt.err (!%p2752_p5)
}
 0x197   : > { %s2756_s9 = scalar_lea.hbm %s3679_s29, 4096  ;;  %s2760_s12 = scalar_lea.hbm %s3871_s2, 200704 }
 0x198   : > { %p2757_p6 = scmp.ne.s32.totalorder %s3679_s29, %s2756_s9  ;;  %p2761_p10 = scmp.lt.u32.totalorder %s3679_s29, %s3871_s2 }
 0x199   : > { %p2762_p11 = scmp.lt.u32.totalorder %s2760_s12, %s2756_s9  ;;  %p2764_p13 = scmp.lt.u32.totalorder %s2756_s9, %s3679_s29 }
 0x19a   : > { %p2758_p7 = pnand %p2757_p6, %p2893_p4 }
 0x19b   : > { %p2763_p12 = por %p2762_p11, %p2761_p10 }
 0x19c   : > { %p2759_p9 = pneg %p2758_p7 }
 0x19d   : > { %p2765_p0 = por %p2764_p13, %p2763_p12 }
 0x19f   : > { %p2766_p1 = pnand %p2765_p0, %p2759_p9 }
 0x1a1   : > { %2769 = shalt.err (!%p2766_p1)
}
 0x1a2   : > { %s2826_s21 = smov 64   ;;  %s2827_s24 = smov 4   ;;  %v1845_v16 = vadd.f32 %v1844_v10, %v1843_v3  ;;  %v2042_v18 = vadd.f32 %v2041_v25, %v2040_v5  ;;  %v2043_v59 = vsel %vm310_vm3, %v1946_v0, 0.0  ;;  %v1846_v19 = vsel %vm310_vm3, %v2734_v12, 0.0  ;;  %v2735_v41 = vld [vmem:[#allocation2 + $0x120] sm:$0xff]  ;;  %v2736_v23 = vld [vmem:[#allocation2 + $0x128] sm:$0xff] }
 0x1a3   : > { %2565 = dma.vmem_to_hbm [thread:$0]  (%p2893_p4), %s3681_s22, 4096, %s3679_s29, %s3693_s30, %s2826_s21, %s2826_s21, %s2827_s24   ;;  %v1948_v27 = vmul.f32 %v2735_v41, %v2735_v41  ;;  %v2045_v26 = vsel %vm310_vm3, %v1947_v14, 0.0  ;;  %v1848_v50 = vsel %vm310_vm3, %v2735_v41, 0.0  ;;  %v1949_v31 = vmul.f32 %v2736_v23, %v2736_v23  ;;  %v2737_v37 = vld [vmem:[#allocation2 + $0x130] sm:$0xff]  ;;  %v2738_v46 = vld [vmem:[#allocation2 + $0x138] sm:$0xff]  ;;  %v2739_v60 = vld [vmem:[#allocation2 + $0x140] sm:$0xff] }
 0x1a4   : > { %v1847_v22 = vadd.f32 %v1846_v19, %v1845_v16  ;;  %v2044_v34 = vadd.f32 %v2043_v59, %v2042_v18  ;;  %v1850_v49 = vsel %vm310_vm3, %v2736_v23, 0.0  ;;  %v1950_v38 = vmul.f32 %v2737_v37, %v2737_v37  ;;  %v2740_v15 = vld [vmem:[#allocation2 + $0x148] sm:$0xff]  ;;  %v2741_v10 = vld [vmem:[#allocation2 + $0x150] sm:$0xff]  ;;  %p293_p4 = scmp.lt.s32.totalorder %s2812_s18, 48 }
 0x1a5   : > { %v2047_v36 = vsel %vm310_vm3, %v1948_v27, 0.0  ;;  %v2049_v43 = vsel %vm310_vm3, %v1949_v31, 0.0  ;;  %v1852_v44 = vsel %vm310_vm3, %v2737_v37, 0.0  ;;  %v1951_v20 = vmul.f32 %v2738_v46, %v2738_v46 }
 0x1a6   : > { %v1849_v33 = vadd.f32 %v1848_v50, %v1847_v22  ;;  %v2046_v35 = vadd.f32 %v2045_v26, %v2044_v34  ;;  %v2051_v53 = vsel %vm310_vm3, %v1950_v38, 0.0  ;;  %v1854_v42 = vsel %vm310_vm3, %v2738_v46, 0.0  ;;  %s3886_s18 = smov (!%p293_p4, %s2812_s18), 48 }
 0x1a7   : > { %v1952_v57 = vmul.f32 %v2739_v60, %v2739_v60  ;;  %v2053_v61 = vsel %vm310_vm3, %v1951_v20, 0.0  ;;  %v1856_v62 = vsel %vm310_vm3, %v2739_v60, 0.0  ;;  %v1953_v63 = vmul.f32 %v2740_v15, %v2740_v15  ;;  %s298_s26 = scalar_lea.vmem %s3872_s3, %s3886_s18  ;;  %s304_s5 = scalar_lea.vmem %s3873_s4, %s3886_s18 }
 0x1a8   : > { %v1851_v39 = vadd.f32 %v1850_v49, %v1849_v33  ;;  %v2048_v40 = vadd.f32 %v2047_v36, %v2046_v35  ;;  %v1858_v25 = vsel %vm310_vm3, %v2740_v15, 0.0  ;;  %v1954_v12 = vmul.f32 %v2741_v10, %v2741_v10 }
 0x1a9   : > { %v2055_v5 = vsel %vm310_vm3, %v1952_v57, 0.0  ;;  %v2057_v18 = vsel %vm310_vm3, %v1953_v63, 0.0  ;;  %v1860_v59 = vsel %vm310_vm3, %v2741_v10, 0.0  ;;  %v1955_v19 = vmul.f32 %v3349_v17, %v3349_v17 }
 0x1aa   : > { %v1853_v4 = vadd.f32 %v1852_v44, %v1851_v39  ;;  %v2050_v52 = vadd.f32 %v2049_v43, %v2048_v40  ;;  %v2059_v22 = vsel %vm310_vm3, %v1954_v12, 0.0  ;;  %v1862_v34 = vsel %vm310_vm3, %v3349_v17, 0.0 }
 0x1ab   : > { %v1956_v26 = vmul.f32 %v3361_v32, %v3361_v32  ;;  %v2061_v31 = vsel %vm310_vm3, %v1955_v19, 0.0  ;;  %v1864_v33 = vsel %vm310_vm3, %v3361_v32, 0.0  ;;  %v1957_v35 = vmul.f32 %v3390_v54, %v3390_v54 }
 0x1ac   : > { %v1855_v45 = vadd.f32 %v1854_v42, %v1853_v4  ;;  %v2052_v30 = vadd.f32 %v2051_v53, %v2050_v52  ;;  %v1866_v17 = vsel %vm310_vm3, %v3390_v54, 0.0  ;;  %v1958_v38 = vmul.f32 %v3402_v7, %v3402_v7 }
 0x1ad   : > { %v2063_v37 = vsel %vm310_vm3, %v1956_v26, 0.0  ;;  %v2065_v43 = vsel %vm310_vm3, %v1957_v35, 0.0  ;;  %v1868_v32 = vsel %vm310_vm3, %v3402_v7, 0.0  ;;  %v1959_v44 = vmul.f32 %v3431_v55, %v3431_v55 }
 0x1ae   : > { %v2054_v0 = vadd.f32 %v2053_v61, %v2052_v30  ;;  %v1857_v3 = vadd.f32 %v1856_v62, %v1855_v45  ;;  %v2067_v4 = vsel %vm310_vm3, %v1958_v38, 0.0  ;;  %v1870_v54 = vsel %vm310_vm3, %v3431_v55, 0.0 }
 0x1af   : > { %v1960_v52 = vmul.f32 %v3444_v47, %v3444_v47  ;;  %v2069_v60 = vsel %vm310_vm3, %v1959_v44, 0.0  ;;  %v1872_v7 = vsel %vm310_vm3, %v3444_v47, 0.0  ;;  %v1961_v57 = vmul.f32 %v3473_v8, %v3473_v8 }
 0x1b0   : > { %v1859_v14 = vadd.f32 %v1858_v25, %v1857_v3  ;;  %v2056_v16 = vadd.f32 %v2055_v5, %v2054_v0  ;;  %v1874_v55 = vsel %vm310_vm3, %v3473_v8, 0.0  ;;  %v1962_v62 = vmul.f32 %v3485_v24, %v3485_v24 }
 0x1b1   : > { %v2071_v61 = vsel %vm310_vm3, %v1960_v52, 0.0  ;;  %v2073_v0 = vsel %vm310_vm3, %v1961_v57, 0.0  ;;  %v1876_v47 = vsel %vm310_vm3, %v3485_v24, 0.0  ;;  %v1963_v3 = vmul.f32 %v3514_v51, %v3514_v51 }
 0x1b2   : > { %v1861_v41 = vadd.f32 %v1860_v59, %v1859_v14  ;;  %v2058_v27 = vadd.f32 %v2057_v18, %v2056_v16  ;;  %v2075_v10 = vsel %vm310_vm3, %v1962_v62, 0.0  ;;  %v1878_v8 = vsel %vm310_vm3, %v3514_v51, 0.0 }
 0x1b3   : > { %v1964_v12 = vmul.f32 %v3524_v2, %v3524_v2  ;;  %v2077_v18 = vsel %vm310_vm3, %v1963_v3, 0.0  ;;  %v1880_v24 = vsel %vm310_vm3, %v3524_v2, 0.0  ;;  %v1965_v59 = vmul.f32 %v3547_v6, %v3547_v6 }
 0x1b4   : > { %v1863_v50 = vadd.f32 %v1862_v34, %v1861_v41  ;;  %v2060_v23 = vadd.f32 %v2059_v22, %v2058_v27  ;;  %v1882_v51 = vsel %vm310_vm3, %v3547_v6, 0.0  ;;  %v1966_v22 = vmul.f32 %v3556_v48, %v3556_v48 }
 0x1b5   : > { %v2079_v27 = vsel %vm310_vm3, %v1964_v12, 0.0  ;;  %v1884_v2 = vsel %vm310_vm3, %v3556_v48, 0.0  ;;  %v1886_v6 = vsel %vm310_vm3, %v3573_v11, 0.0  ;;  %v1888_v48 = vsel %vm310_vm3, %v3582_v28, 0.0 }
 0x1b6   : > { %v1865_v36 = vadd.f32 %v1864_v33, %v1863_v50  ;;  %v2062_v49 = vadd.f32 %v2061_v31, %v2060_v23  ;;  %v2081_v50 = vsel %vm310_vm3, %v1965_v59, 0.0  ;;  %v1967_v23 = vmul.f32 %v3573_v11, %v3573_v11 }
 0x1b7   : > { %v2083_v35 = vsel %vm310_vm3, %v1966_v22, 0.0  ;;  %v1969_v38 = vmul.f32 %v3599_v56, %v3599_v56  ;;  %v1890_v11 = vsel %vm310_vm3, %v3599_v56, 0.0  ;;  %v1894_v56 = vsel %vm310_vm3, %v3624_v1, 0.0 }
 0x1b8   : > { %v1867_v39 = vadd.f32 %v1866_v17, %v1865_v36  ;;  %v2064_v40 = vadd.f32 %v2063_v37, %v2062_v49  ;;  %v1968_v36 = vmul.f32 %v3582_v28, %v3582_v28  ;;  %v2085_v17 = vsel %vm310_vm3, %v1967_v23, 0.0 }
 0x1b9   : > { %v1892_v28 = vsel %vm310_vm3, %v3607_v13, 0.0  ;;  %v1898_v62 = vsel %vm310_vm3, %v3649_v21, 0.0  ;;  %v1975_v3 = vmul.f32 %v3674_v58, %v3674_v58  ;;  %vm1910_vm5 = vcmask 516096  }
 0x1ba   : > { %v1869_v46 = vadd.f32 %v1868_v32, %v1867_v39  ;;  %v2066_v20 = vadd.f32 %v2065_v43, %v2064_v40  ;;  %v2087_v43 = vsel %vm310_vm3, %v1968_v36, 0.0  ;;  %v1970_v32 = vmul.f32 %v3607_v13, %v3607_v13 }
 0x1bb   : > { %v1896_v13 = vsel %vm310_vm3, %v3633_v9, 0.0  ;;  %v2101_v12 = vsel %vm310_vm3, %v1975_v3, 0.0 }
 0x1bc   : > { %v1871_v53 = vadd.f32 %v1870_v54, %v1869_v46  ;;  %v2068_v42 = vadd.f32 %v2067_v4, %v2066_v20  ;;  %v2089_v20 = vsel %vm310_vm3, %v1969_v38, 0.0  ;;  %v1971_v4 = vmul.f32 %v3624_v1, %v3624_v1 }
 0x1be   : > { %v1873_v45 = vadd.f32 %v1872_v7, %v1871_v53  ;;  %v2070_v30 = vadd.f32 %v2069_v60, %v2068_v42  ;;  %v2091_v53 = vsel %vm310_vm3, %v1970_v32, 0.0  ;;  %v1972_v42 = vmul.f32 %v3633_v9, %v3633_v9 }
 0x1bf   : > { %v2093_v57 = vsel %vm310_vm3, %v1971_v4, 0.0 }
 0x1c0   : > { %v2072_v15 = vadd.f32 %v2071_v61, %v2070_v30  ;;  %v1875_v63 = vadd.f32 %v1874_v55, %v1873_v45  ;;  %v1973_v45 = vmul.f32 %v3649_v21, %v3649_v21  ;;  %v1974_v30 = vmul.f32 %v3657_v29, %v3657_v29 }
 0x1c1   : > { %v2095_v1 = vsel %vm310_vm3, %v1972_v42, 0.0 }
 0x1c2   : > { %v2074_v5 = vadd.f32 %v2073_v0, %v2072_v15  ;;  %v1877_v25 = vadd.f32 %v1876_v47, %v1875_v63  ;;  %v1900_v15 = vsel %vm310_vm3, %v3657_v29, 0.0  ;;  %v2097_v9 = vsel %vm310_vm3, %v1973_v45, 0.0 }
 0x1c3   : > { %v2099_v47 = vsel %vm310_vm3, %v1974_v30, 0.0 }
 0x1c4   : > { %v2076_v14 = vadd.f32 %v2075_v10, %v2074_v5  ;;  %v1879_v16 = vadd.f32 %v1878_v8, %v1877_v25  ;;  %v1902_v10 = vsel %vm310_vm3, %v3674_v58, 0.0 }
 0x1c6   : > { %v2078_v19 = vadd.f32 %v2077_v18, %v2076_v14  ;;  %v1881_v41 = vadd.f32 %v1880_v24, %v1879_v16 }
 0x1c8   : > { %v2080_v34 = vadd.f32 %v2079_v27, %v2078_v19  ;;  %v1883_v26 = vadd.f32 %v1882_v51, %v1881_v41 }
 0x1ca   : > { %v2082_v31 = vadd.f32 %v2081_v50, %v2080_v34  ;;  %v1885_v33 = vadd.f32 %v1884_v2, %v1883_v26 }
 0x1cc   : > { %v2084_v49 = vadd.f32 %v2083_v35, %v2082_v31  ;;  %v1887_v37 = vadd.f32 %v1886_v6, %v1885_v33 }
 0x1ce   : > { %v2086_v39 = vadd.f32 %v2085_v17, %v2084_v49  ;;  %v1889_v40 = vadd.f32 %v1888_v48, %v1887_v37 }
 0x1d0   : > { %v2088_v44 = vadd.f32 %v2087_v43, %v2086_v39  ;;  %v1891_v46 = vadd.f32 %v1890_v11, %v1889_v40 }
 0x1d2   : > { %v2090_v54 = vadd.f32 %v2089_v20, %v2088_v44  ;;  %v1893_v52 = vadd.f32 %v1892_v28, %v1891_v46 }
 0x1d4   : > { %v2092_v60 = vadd.f32 %v2091_v53, %v2090_v54  ;;  %v1895_v7 = vadd.f32 %v1894_v56, %v1893_v52 }
 0x1d6   : > { %v2094_v61 = vadd.f32 %v2093_v57, %v2092_v60  ;;  %v1897_v55 = vadd.f32 %v1896_v13, %v1895_v7 }
 0x1d8   : > { %v2096_v63 = vadd.f32 %v2095_v1, %v2094_v61  ;;  %v1899_v0 = vadd.f32 %v1898_v62, %v1897_v55 }
 0x1da   : > { %v2098_v5 = vadd.f32 %v2097_v9, %v2096_v63  ;;  %v1901_v25 = vadd.f32 %v1900_v15, %v1899_v0 }
 0x1dc   : > { %v2100_v8 = vadd.f32 %v2099_v47, %v2098_v5  ;;  %v1903_v21 = vadd.f32 %v1902_v10, %v1901_v25 }
 0x1de   : > { %v1904_v29 = vrot.slane %v1903_v21, 4  ;;  %v2102_v14 = vadd.f32 %v2101_v12, %v2100_v8 }
 0x1e0   : > { %v1905_v16 = vadd.f32 %v1904_v29, %v1903_v21  ;;  %v2103_v18 = vrot.slane %v2102_v14, 4 }
 0x1e2   : > { %v1906_v24 = vrot.slane %v1905_v16, 2  ;;  %v2104_v59 = vadd.f32 %v2103_v18, %v2102_v14 }
 0x1e4   : > { %v1907_v19 = vadd.f32 %v1906_v24, %v1905_v16  ;;  %v2105_v41 = vrot.slane %v2104_v59, 2 }
 0x1e6   : > { %v1908_v27 = vrot.slane %v1907_v19, 1  ;;  %v2106_v51 = vadd.f32 %v2105_v41, %v2104_v59 }
 0x1e8   : > { %v1909_v58 = vadd.f32 %v1908_v27, %v1907_v19  ;;  %v2107_v22 = vrot.slane %v2106_v51, 1 }
 0x1ea   : > { %1911 = vst.msk [vmem:[%s298_s26] sm:$0x1] %vm1910_vm5, %v1909_v58  ;;  %v2108_v34 = vadd.f32 %v2107_v22, %v2106_v51 }
 0x1ec   : > { %2109 = vst.msk [vmem:[%s304_s5] sm:$0x1] %vm1910_vm5, %v2108_v34 }
 0x1ed PF: > { %p2571_p2 = scmp.ge.s32.totalorder %s2820_s20, 2  ;;  %s2158_s6 = sand.u32 1, %s2800_s15  }
 0x1ee   : > { %s2159_s7 = scalar_lea.sflag [#allocation4], %s2158_s6 }
 0x1ef   : > { %p2568_p3 = pnand %p2571_p2, %p2900_p8 }
 0x1f1   : > { %2795 = dma.done.wait (!%p2568_p3), %s2159_s7, 4096  }
 0x1f2   : > { %2797 = vsyncadd (!%p2568_p3), %s2159_s7, 4294963200  ;;  %s18_s20 = sadd.s32 1, %s2820_s20   ;;  %s3876_s15 = smov %s2804_s16 }
 0x1f3   : > { %p15_p5 = scmp.ge.s32.totalorder %s18_s20, 51   ;;  %s3877_s16 = smov %s2808_s17 }
 0x1f4   : > { %s3878_s17 = smov %s2906_s28  ;;  %s3879_s18 = smov %s2816_s19 }
 0x1f5   : > { %s3880_s19 = smov %s3882_s23  ;;  %17 = sbr.rel (!%p15_p5) target bundleno = 4 (0x4), region = 98 }
 0x1fc   :  { %2182 = vsyncpa [#allocation4], 1 }
 0x1fd   :  { %2184 = vsyncpa [#allocation4 + $0x1], 1 }

</bundles_post_ra>
